<compile_context>
chip_gen: v6e
topology: v6e:2x2x1
jax: 0.10.0
libtpu: 0.0.40
codegen_flags: <defaults>
</compile_context>

<pallas_src>
import numpy as np
import jax
import jax.numpy as jnp
from jax.experimental import pallas as pl
from jax.experimental.pallas import tpu as pltpu

# Fits inside v7x's 64 MiB physical VMEM with headroom; plenty on v5e/v6e.
VMEM_LIMIT_BYTES = 48 * 1024 * 1024


# --------------------------------------------------------------------------
# Kernel 1: per-row-tile feature transform  h1[rows] = dinv[rows] * (X[rows] @ W1)
# --------------------------------------------------------------------------
def _transform1_kernel(x_ref, dinv_ref, w1_ref, h1_ref):
    h = jnp.dot(x_ref[...], w1_ref[...], preferred_element_type=jnp.float32)
    # store bf16 so it feeds the bf16 MXU aggregation directly
    h1_ref[...] = (dinv_ref[...] * h).astype(h1_ref.dtype)


# --------------------------------------------------------------------------
# Kernel 2: layer-1 aggregation + relu, fused with layer-2 feature transform
#   z1[rows] = relu(dinv[rows] * (M[rows, :] @ h1) + b1)
#   h2[rows] = dinv[rows] * (z1 @ W2)           (stored bf16)
# --------------------------------------------------------------------------
def _hidden_kernel(m_ref, h1_ref, dinv_ref, b1_ref, w2_ref, h2_ref):
    agg = jnp.dot(m_ref[...], h1_ref[...], preferred_element_type=jnp.float32)
    z1 = jnp.maximum(dinv_ref[...] * agg + b1_ref[...], 0.0)
    h2 = dinv_ref[...] * jnp.dot(z1, w2_ref[...], preferred_element_type=jnp.float32)
    h2_ref[...] = h2.astype(h2_ref.dtype)


# --------------------------------------------------------------------------
# Kernel 3: layer-2 aggregation + log_softmax + per-tile reg partial
#   reg = trace(A@A),  A = M^T - I  =>  sum_ij M[i,j]M[j,i] - 2 tr(M) + N
# --------------------------------------------------------------------------
def _output_kernel(mr_ref, mc_ref, h2_ref, dinv_ref, b2_ref, out_ref, reg_ref):
    tm = mr_ref.shape[0]

    logits = (dinv_ref[...]
              * jnp.dot(mr_ref[...], h2_ref[...], preferred_element_type=jnp.float32)
              + b2_ref[...])
    mx = jnp.max(logits, axis=1, keepdims=True)
    sh = logits - mx
    lse = jnp.log(jnp.sum(jnp.exp(sh), axis=1, keepdims=True))
    out_ref[...] = sh - lse

    # Cross term pairs the (TM, N) row block with the (N, TM) column block of
    # the SAME bf16 M (values are exact small integers). VPU/XLU work only —
    # off the mem-bound critical path.
    mr = mr_ref[...].astype(jnp.float32)          # (tm, N)
    mct = mc_ref[...].astype(jnp.float32).T       # (N, tm) -> (tm, N), XLU transpose
    cross = jnp.sum(mr * mct)
    i0 = pl.program_id(0) * tm
    rows = i0 + jax.lax.broadcasted_iota(jnp.int32, mr.shape, 0)
    cols = jax.lax.broadcasted_iota(jnp.int32, mr.shape, 1)
    diag = jnp.sum(jnp.where(rows == cols, mr, 0.0))
    partial = cross - 2.0 * diag + jnp.float32(tm)

    # Disjoint (8,128)-aligned block per grid step -> no cross-step state, so
    # the grid axis stays "parallel" (megacore on v7x).
    reg_ref[...] = jnp.full(reg_ref.shape, partial, jnp.float32)


# --------------------------------------------------------------------------
# Wrapper
# --------------------------------------------------------------------------
def gcn_forward(x, edge_index, params):
    """params = (w1, b1, w2, b2, laplacian_weight); laplacian_weight unused in fwd."""
    N, f_in = x.shape
    w1, b1, w2, b2, _lap_w = params
    hid, c = w1.shape[1], w2.shape[1]
    src, dst = edge_index[0], edge_index[1]
    n_edges = src.shape[0]

    # Plain-JAX glue: densify edge_index into the single message matrix
    # M[i, j] = #edges j->i + self loop (duplicates sum, like sparse_coo_tensor).
    # Self loops are folded into the same scatter, straight into bf16 (exact
    # for these small integer counts) -> only one N^2 array ever materialized.
    diag_idx = jnp.arange(N, dtype=src.dtype)
    dst_all = jnp.concatenate([dst, diag_idx])
    src_all = jnp.concatenate([src, diag_idx])
    m = jnp.zeros((N, N), jnp.bfloat16).at[dst_all, src_all].add(
        jnp.ones(dst_all.shape[0], jnp.bfloat16))
    # deg[i] = sum_j M[i, j] = in-degree + 1 : O(E) scatter, kept in f32.
    deg = jnp.ones((N,), jnp.float32).at[dst].add(jnp.ones(n_edges, jnp.float32))
    dinv = jax.lax.rsqrt(deg).reshape(N, 1)

    tm = 128 if N % 128 == 0 else N            # row-tile size (lane/sublane aligned)
    nt = N // tm
    b1_2d, b2_2d = b1.reshape(1, -1), b2.reshape(1, -1)

    # ---- kernel 1: h1 = dinv * (X @ W1), row-parallel ----
    h1 = pl.pallas_call(
        _transform1_kernel,
        out_shape=jax.ShapeDtypeStruct((N, hid), jnp.bfloat16),
        grid=(nt,),
        in_specs=[pl.BlockSpec((tm, f_in), lambda i: (i, 0)),
                  pl.BlockSpec((tm, 1), lambda i: (i, 0)),
                  pl.BlockSpec((f_in, hid), lambda i: (0, 0))],
        out_specs=pl.BlockSpec((tm, hid), lambda i: (i, 0)),
        compiler_params=pltpu.CompilerParams(
            dimension_semantics=("parallel",),
            vmem_limit_bytes=VMEM_LIMIT_BYTES),
    )(x, dinv, w1)

    # ---- kernel 2: stream (tm, N) bf16 tiles of M; layer-1 agg + relu + @W2 ----
    h2 = pl.pallas_call(
        _hidden_kernel,
        out_shape=jax.ShapeDtypeStruct((N, c), jnp.bfloat16),
        grid=(nt,),
        in_specs=[pl.BlockSpec((tm, N), lambda i: (i, 0)),    # M row tile (streamed)
                  pl.BlockSpec((N, hid), lambda i: (0, 0)),   # h1 (stays resident)
                  pl.BlockSpec((tm, 1), lambda i: (i, 0)),    # dinv rows
                  pl.BlockSpec((1, hid), lambda i: (0, 0)),   # b1
                  pl.BlockSpec((hid, c), lambda i: (0, 0))],  # W2
        out_specs=pl.BlockSpec((tm, c), lambda i: (i, 0)),
        compiler_params=pltpu.CompilerParams(
            dimension_semantics=("parallel",),
            vmem_limit_bytes=VMEM_LIMIT_BYTES),
    )(m, h1, dinv, b1_2d, w2)

    # ---- kernel 3: layer-2 agg + log_softmax + per-tile reg partials,
    #      fully row-parallel (no shared accumulator). ----
    log_probs, reg_parts = pl.pallas_call(
        _output_kernel,
        out_shape=(jax.ShapeDtypeStruct((N, c), jnp.float32),
                   jax.ShapeDtypeStruct((8, nt * 128), jnp.float32)),
        grid=(nt,),
        in_specs=[pl.BlockSpec((tm, N), lambda i: (i, 0)),    # M row tile
                  pl.BlockSpec((N, tm), lambda i: (0, i)),    # M col tile (for reg)
                  pl.BlockSpec((N, c), lambda i: (0, 0)),     # h2 (stays resident)
                  pl.BlockSpec((tm, 1), lambda i: (i, 0)),    # dinv rows
                  pl.BlockSpec((1, c), lambda i: (0, 0))],    # b2
        out_specs=(pl.BlockSpec((tm, c), lambda i: (i, 0)),
                   pl.BlockSpec((8, 128), lambda i: (0, i))),
        compiler_params=pltpu.CompilerParams(
            dimension_semantics=("parallel",),
            vmem_limit_bytes=VMEM_LIMIT_BYTES),
    )(m, m, h2, dinv, b2_2d)

    reg = jnp.sum(reg_parts[0, ::128])           # nt scalars -> trivial JAX finish
    return log_probs, reg


# --------------------------------------------------------------------------
# Pure-JAX f32 reference (same semantics as the PyTorch module)
# --------------------------------------------------------------------------
def reference_forward(x, edge_index, params):
    N = x.shape[0]
    w1, b1, w2, b2, _ = params
    src, dst = edge_index[0], edge_index[1]
    A = jnp.zeros((N, N), jnp.float32).at[src, dst].add(1.0)
    M = A.T + jnp.eye(N, dtype=jnp.float32)
    deg = jnp.sum(M, axis=1, keepdims=True)
    dinv = 1.0 / jnp.sqrt(deg)
    Mn = dinv * M * dinv.T
    h = jnp.maximum(Mn @ (x @ w1) + b1, 0.0)
    h = Mn @ (h @ w2) + b2
    out = jax.nn.log_softmax(h, axis=1)
    reg = jnp.trace(A @ A)
    return out, reg


def glorot(key, shape):
    bound = float(np.sqrt(6.0 / (shape[0] + shape[1])))
    return jax.random.uniform(key, shape, jnp.float32, -bound, bound)


if __name__ == "__main__":
    # Small shapes consistent with the module: num_layers=2, hidden_features=16.
    # N=256 with TM=128 exercises a 2-step grid (tile streaming + reg partials).
    N, F_IN, HID, C, E = 256, 32, 16, 8, 1024

    key = jax.random.PRNGKey(0)
    kx, ks, kd, kw1, kw2, klap = jax.random.split(key, 6)

    x = jax.random.normal(kx, (N, F_IN), jnp.float32)
    src = jax.random.randint(ks, (E,), 0, N, dtype=jnp.int32)
    dst = jax.random.randint(kd, (E,), 0, N, dtype=jnp.int32)
    edge_index = jnp.stack([src, dst])                       # (2, E), like PyG

    # GCNConv init: glorot weight, zero bias; laplacian_weight xavier (unused in fwd).
    w1 = glorot(kw1, (F_IN, HID))
    b1 = jnp.zeros((HID,), jnp.float32)
    w2 = glorot(kw2, (HID, C))
    b2 = jnp.zeros((C,), jnp.float32)
    lap_w = glorot(klap, (HID, HID))
    params = (w1, b1, w2, b2, lap_w)

    fwd = jax.jit(gcn_forward)
    log_probs, reg_loss = fwd(x, edge_index, params)
    jax.block_until_ready((log_probs, reg_loss))

    ref_lp, ref_reg = reference_forward(x, edge_index, params)
    # Tolerance covers the bf16-MXU path (M / h1 / h2 operands in bf16, f32 accum).
    np.testing.assert_allclose(np.asarray(log_probs), np.asarray(ref_lp),
                               rtol=3e-2, atol=3e-2)
    np.testing.assert_allclose(float(reg_loss), float(ref_reg), rtol=1e-3, atol=1e-3)

    print("KERNEL_OK")
</pallas_src>

<mosaic_0001>
module attributes {stable_mosaic.version = 11 : i64} {
  func.func private @main(%arg0: i32) attributes {dimension_semantics = [#tpu.dimension_semantics<core_parallel>], iteration_bounds = array<i64: 2>, tpu.core_type = #tpu.core_type<sc_scalar_subcore>, window_params = []} {
    return
  }
}

module attributes {stable_mosaic.version = 11 : i64} {
  func.func private @main(%arg0: i32) attributes {dimension_semantics = [#tpu.dimension_semantics<core_parallel>], iteration_bounds = array<i64: 2>, tpu.core_type = #tpu.core_type<sc_scalar_subcore>, window_params = []} {
    return
  }
}

module attributes {stable_mosaic.version = 11 : i64} {
  func.func @_transform1_kernel(%arg0: i32, %arg1: memref<128x32xf32, #tpu.memory_space<vmem>>, %arg2: memref<128x1xf32, #tpu.memory_space<vmem>>, %arg3: memref<32x16xf32, #tpu.memory_space<vmem>>, %arg4: memref<128x16xbf16, #tpu.memory_space<vmem>>) attributes {dimension_semantics = [#tpu.dimension_semantics<parallel>], iteration_bounds = array<i64: 2>, scalar_prefetch = 0 : i64, scratch_operands = 0 : i64, tpu.core_type = #tpu.core_type<tc>, window_params = [{transform_indices = @transform_0, window_bounds = array<i64: 128, 32>}, {transform_indices = @transform_1, window_bounds = array<i64: 128, 1>}, {pipeline_mode = #tpu.pipeline_mode<synchronous>, transform_indices = @transform_2, window_bounds = array<i64: 32, 16>}, {transform_indices = @transform_3, window_bounds = array<i64: 128, 16>}]} {
    %c0 = arith.constant 0 : index
    %c0_0 = arith.constant 0 : index
    %0 = vector.load %arg1[%c0, %c0_0] : memref<128x32xf32, #tpu.memory_space<vmem>>, vector<128x32xf32>
    %c0_1 = arith.constant 0 : index
    %c0_2 = arith.constant 0 : index
    %1 = vector.load %arg3[%c0_1, %c0_2] : memref<32x16xf32, #tpu.memory_space<vmem>>, vector<32x16xf32>
    %cst = arith.constant dense<0.000000e+00> : vector<128x16xf32>
    %2 = tpu.matmul %0, %1, %cst {dimension_numbers = #tpu.dot_dimension_numbers<[1], [0], [0], [1], [0, 0, 1, 1], [], []>} : vector<128x32xf32>, vector<32x16xf32>, vector<128x16xf32> -> vector<128x16xf32>
    %c0_3 = arith.constant 0 : index
    %c0_4 = arith.constant 0 : index
    %3 = vector.load %arg2[%c0_3, %c0_4] : memref<128x1xf32, #tpu.memory_space<vmem>>, vector<128x1xf32>
    %4 = vector.broadcast %3 : vector<128x1xf32> to vector<128x16xf32>
    %5 = arith.mulf %4, %2 : vector<128x16xf32>
    %6 = arith.truncf %5 : vector<128x16xf32> to vector<128x16xbf16>
    %c0_5 = arith.constant 0 : index
    %c0_6 = arith.constant 0 : index
    %7 = vector.load %arg4[%c0_5, %c0_6] : memref<128x16xbf16, #tpu.memory_space<vmem>>, vector<128x16xbf16>
    tpu.vector_store %arg4[%c0_5, %c0_6], %6 {strides = array<i32>} : memref<128x16xbf16, #tpu.memory_space<vmem>>, vector<128x16xbf16>,
    return
  }
  func.func @transform_0(%arg0: i32) -> (i32, i32) {
    %c0_i32 = arith.constant 0 : i32
    %c0_i32_0 = arith.constant 0 : i32
    return %arg0, %c0_i32 : i32, i32
  }
  func.func @transform_1(%arg0: i32) -> (i32, i32) {
    %c0_i32 = arith.constant 0 : i32
    %c0_i32_0 = arith.constant 0 : i32
    return %arg0, %c0_i32 : i32, i32
  }
  func.func @transform_2(%arg0: i32) -> (i32, i32) {
    %c0_i32 = arith.constant 0 : i32
    %c0_i32_0 = arith.constant 0 : i32
    %c0_i32_1 = arith.constant 0 : i32
    return %c0_i32, %c0_i32_0 : i32, i32
  }
  func.func @transform_3(%arg0: i32) -> (i32, i32) {
    %c0_i32 = arith.constant 0 : i32
    %c0_i32_0 = arith.constant 0 : i32
    return %arg0, %c0_i32 : i32, i32
  }
}

module attributes {stable_mosaic.version = 11 : i64} {
  func.func @_hidden_kernel(%arg0: i32, %arg1: memref<128x256xbf16, #tpu.memory_space<vmem>>, %arg2: memref<256x16xbf16, #tpu.memory_space<vmem>>, %arg3: memref<128x1xf32, #tpu.memory_space<vmem>>, %arg4: memref<1x16xf32, #tpu.memory_space<vmem>>, %arg5: memref<16x8xf32, #tpu.memory_space<vmem>>, %arg6: memref<128x8xbf16, #tpu.memory_space<vmem>>) attributes {dimension_semantics = [#tpu.dimension_semantics<parallel>], iteration_bounds = array<i64: 2>, scalar_prefetch = 0 : i64, scratch_operands = 0 : i64, tpu.core_type = #tpu.core_type<tc>, window_params = [{transform_indices = @transform_0, window_bounds = array<i64: 128, 256>}, {pipeline_mode = #tpu.pipeline_mode<synchronous>, transform_indices = @transform_1, window_bounds = array<i64: 256, 16>}, {transform_indices = @transform_2, window_bounds = array<i64: 128, 1>}, {pipeline_mode = #tpu.pipeline_mode<synchronous>, transform_indices = @transform_3, window_bounds = array<i64: 1, 16>}, {pipeline_mode = #tpu.pipeline_mode<synchronous>, transform_indices = @transform_4, window_bounds = array<i64: 16, 8>}, {transform_indices = @transform_5, window_bounds = array<i64: 128, 8>}]} {
    %c0 = arith.constant 0 : index
    %c0_0 = arith.constant 0 : index
    %0 = vector.load %arg1[%c0, %c0_0] : memref<128x256xbf16, #tpu.memory_space<vmem>>, vector<128x256xbf16>
    %c0_1 = arith.constant 0 : index
    %c0_2 = arith.constant 0 : index
    %1 = vector.load %arg2[%c0_1, %c0_2] : memref<256x16xbf16, #tpu.memory_space<vmem>>, vector<256x16xbf16>
    %cst = arith.constant dense<0.000000e+00> : vector<128x16xf32>
    %2 = tpu.matmul %0, %1, %cst {dimension_numbers = #tpu.dot_dimension_numbers<[1], [0], [0], [1], [0, 0, 1, 1], [], []>} : vector<128x256xbf16>, vector<256x16xbf16>, vector<128x16xf32> -> vector<128x16xf32>
    %c0_3 = arith.constant 0 : index
    %c0_4 = arith.constant 0 : index
    %3 = vector.load %arg3[%c0_3, %c0_4] : memref<128x1xf32, #tpu.memory_space<vmem>>, vector<128x1xf32>
    %4 = vector.broadcast %3 : vector<128x1xf32> to vector<128x16xf32>
    %5 = arith.mulf %4, %2 : vector<128x16xf32>
    %c0_5 = arith.constant 0 : index
    %c0_6 = arith.constant 0 : index
    %6 = vector.load %arg4[%c0_5, %c0_6] : memref<1x16xf32, #tpu.memory_space<vmem>>, vector<1x16xf32>
    %7 = vector.broadcast %6 : vector<1x16xf32> to vector<128x16xf32>
    %8 = arith.addf %5, %7 : vector<128x16xf32>
    %cst_7 = arith.constant 0.000000e+00 : f32
    %9 = vector.broadcast %cst_7 : f32 to vector<128x16xf32>
    %10 = arith.maximumf %8, %9 : vector<128x16xf32>
    %c0_8 = arith.constant 0 : index
    %c0_9 = arith.constant 0 : index
    %11 = vector.load %arg3[%c0_8, %c0_9] : memref<128x1xf32, #tpu.memory_space<vmem>>, vector<128x1xf32>
    %c0_10 = arith.constant 0 : index
    %c0_11 = arith.constant 0 : index
    %12 = vector.load %arg5[%c0_10, %c0_11] : memref<16x8xf32, #tpu.memory_space<vmem>>, vector<16x8xf32>
    %cst_12 = arith.constant dense<0.000000e+00> : vector<128x8xf32>
    %13 = tpu.matmul %10, %12, %cst_12 {dimension_numbers = #tpu.dot_dimension_numbers<[1], [0], [0], [1], [0, 0, 1, 1], [], []>} : vector<128x16xf32>, vector<16x8xf32>, vector<128x8xf32> -> vector<128x8xf32>
    %14 = vector.broadcast %11 : vector<128x1xf32> to vector<128x8xf32>
    %15 = arith.mulf %14, %13 : vector<128x8xf32>
    %16 = arith.truncf %15 : vector<128x8xf32> to vector<128x8xbf16>
    %c0_13 = arith.constant 0 : index
    %c0_14 = arith.constant 0 : index
    %17 = vector.load %arg6[%c0_13, %c0_14] : memref<128x8xbf16, #tpu.memory_space<vmem>>, vector<128x8xbf16>
    tpu.vector_store %arg6[%c0_13, %c0_14], %16 {strides = array<i32>} : memref<128x8xbf16, #tpu.memory_space<vmem>>, vector<128x8xbf16>,
    return
  }
  func.func @transform_0(%arg0: i32) -> (i32, i32) {
    %c0_i32 = arith.constant 0 : i32
    %c0_i32_0 = arith.constant 0 : i32
    return %arg0, %c0_i32 : i32, i32
  }
  func.func @transform_1(%arg0: i32) -> (i32, i32) {
    %c0_i32 = arith.constant 0 : i32
    %c0_i32_0 = arith.constant 0 : i32
    %c0_i32_1 = arith.constant 0 : i32
    return %c0_i32, %c0_i32_0 : i32, i32
  }
  func.func @transform_2(%arg0: i32) -> (i32, i32) {
    %c0_i32 = arith.constant 0 : i32
    %c0_i32_0 = arith.constant 0 : i32
    return %arg0, %c0_i32 : i32, i32
  }
  func.func @transform_3(%arg0: i32) -> (i32, i32) {
    %c0_i32 = arith.constant 0 : i32
    %c0_i32_0 = arith.constant 0 : i32
    %c0_i32_1 = arith.constant 0 : i32
    return %c0_i32, %c0_i32_0 : i32, i32
  }
  func.func @transform_4(%arg0: i32) -> (i32, i32) {
    %c0_i32 = arith.constant 0 : i32
    %c0_i32_0 = arith.constant 0 : i32
    %c0_i32_1 = arith.constant 0 : i32
    return %c0_i32, %c0_i32_0 : i32, i32
  }
  func.func @transform_5(%arg0: i32) -> (i32, i32) {
    %c0_i32 = arith.constant 0 : i32
    %c0_i32_0 = arith.constant 0 : i32
    return %arg0, %c0_i32 : i32, i32
  }
}

module attributes {stable_mosaic.version = 11 : i64} {
  func.func @_output_kernel(%arg0: i32, %arg1: memref<128x256xbf16, #tpu.memory_space<vmem>>, %arg2: memref<256x128xbf16, #tpu.memory_space<vmem>>, %arg3: memref<256x8xbf16, #tpu.memory_space<vmem>>, %arg4: memref<128x1xf32, #tpu.memory_space<vmem>>, %arg5: memref<1x8xf32, #tpu.memory_space<vmem>>, %arg6: memref<128x8xf32, #tpu.memory_space<vmem>>, %arg7: memref<8x128xf32, #tpu.memory_space<vmem>>) attributes {dimension_semantics = [#tpu.dimension_semantics<parallel>], iteration_bounds = array<i64: 2>, scalar_prefetch = 0 : i64, scratch_operands = 0 : i64, tpu.core_type = #tpu.core_type<tc>, window_params = [{transform_indices = @transform_0, window_bounds = array<i64: 128, 256>}, {transform_indices = @transform_1, window_bounds = array<i64: 256, 128>}, {pipeline_mode = #tpu.pipeline_mode<synchronous>, transform_indices = @transform_2, window_bounds = array<i64: 256, 8>}, {transform_indices = @transform_3, window_bounds = array<i64: 128, 1>}, {pipeline_mode = #tpu.pipeline_mode<synchronous>, transform_indices = @transform_4, window_bounds = array<i64: 1, 8>}, {transform_indices = @transform_5, window_bounds = array<i64: 128, 8>}, {transform_indices = @transform_6, window_bounds = array<i64: 8, 128>}]} {
    %c0 = arith.constant 0 : index
    %c0_0 = arith.constant 0 : index
    %0 = vector.load %arg4[%c0, %c0_0] : memref<128x1xf32, #tpu.memory_space<vmem>>, vector<128x1xf32>
    %c0_1 = arith.constant 0 : index
    %c0_2 = arith.constant 0 : index
    %1 = vector.load %arg1[%c0_1, %c0_2] : memref<128x256xbf16, #tpu.memory_space<vmem>>, vector<128x256xbf16>
    %c0_3 = arith.constant 0 : index
    %c0_4 = arith.constant 0 : index
    %2 = vector.load %arg3[%c0_3, %c0_4] : memref<256x8xbf16, #tpu.memory_space<vmem>>, vector<256x8xbf16>
    %cst = arith.constant dense<0.000000e+00> : vector<128x8xf32>
    %3 = tpu.matmul %1, %2, %cst {dimension_numbers = #tpu.dot_dimension_numbers<[1], [0], [0], [1], [0, 0, 1, 1], [], []>} : vector<128x256xbf16>, vector<256x8xbf16>, vector<128x8xf32> -> vector<128x8xf32>
    %4 = vector.broadcast %0 : vector<128x1xf32> to vector<128x8xf32>
    %5 = arith.mulf %4, %3 : vector<128x8xf32>
    %c0_5 = arith.constant 0 : index
    %c0_6 = arith.constant 0 : index
    %6 = vector.load %arg5[%c0_5, %c0_6] : memref<1x8xf32, #tpu.memory_space<vmem>>, vector<1x8xf32>
    %7 = vector.broadcast %6 : vector<1x8xf32> to vector<128x8xf32>
    %8 = arith.addf %5, %7 : vector<128x8xf32>
    %cst_7 = arith.constant dense<0xFF800000> : vector<128xf32>
    %9 = vector.multi_reduction <maximumf>, %8, %cst_7 [1] : vector<128x8xf32> to vector<128xf32>
    %10 = vector.shape_cast %9 : vector<128xf32> to vector<128x1xf32>
    %11 = vector.broadcast %10 : vector<128x1xf32> to vector<128x8xf32>
    %12 = arith.subf %8, %11 : vector<128x8xf32>
    %13 = math.exp %12 : vector<128x8xf32>
    %cst_8 = arith.constant dense<0.000000e+00> : vector<128xf32>
    %14 = vector.multi_reduction <add>, %13, %cst_8 [1] : vector<128x8xf32> to vector<128xf32>
    %15 = vector.shape_cast %14 : vector<128xf32> to vector<128x1xf32>
    %16 = math.log %15 : vector<128x1xf32>
    %17 = vector.broadcast %16 : vector<128x1xf32> to vector<128x8xf32>
    %18 = arith.subf %12, %17 : vector<128x8xf32>
    %c0_9 = arith.constant 0 : index
    %c0_10 = arith.constant 0 : index
    %19 = vector.load %arg6[%c0_9, %c0_10] : memref<128x8xf32, #tpu.memory_space<vmem>>, vector<128x8xf32>
    tpu.vector_store %arg6[%c0_9, %c0_10], %18 {strides = array<i32>} : memref<128x8xf32, #tpu.memory_space<vmem>>, vector<128x8xf32>,
    %c0_11 = arith.constant 0 : index
    %c0_12 = arith.constant 0 : index
    %20 = vector.load %arg1[%c0_11, %c0_12] : memref<128x256xbf16, #tpu.memory_space<vmem>>, vector<128x256xbf16>
    %21 = arith.extf %20 : vector<128x256xbf16> to vector<128x256xf32>
    %c0_13 = arith.constant 0 : index
    %c0_14 = arith.constant 0 : index
    %22 = vector.load %arg2[%c0_13, %c0_14] : memref<256x128xbf16, #tpu.memory_space<vmem>>, vector<256x128xbf16>
    %23 = arith.extf %22 : vector<256x128xbf16> to vector<256x128xf32>
    %24 = tpu.transpose %23, [1, 0] : vector<256x128xf32> -> vector<128x256xf32>
    %25 = arith.mulf %21, %24 : vector<128x256xf32>
    %26 = vector.shape_cast %25 : vector<128x256xf32> to vector<1x128x256xf32>
    %cst_15 = arith.constant dense<0.000000e+00> : vector<1xf32>
    %27 = vector.multi_reduction <add>, %26, %cst_15 [1, 2] : vector<1x128x256xf32> to vector<1xf32>
    %28 = vector.shape_cast %27 : vector<1xf32> to vector<1x1x1xf32>
    %29 = vector.extract %28[0, 0, 0] : f32 from vector<1x1x1xf32>
    %c128_i32 = arith.constant 128 : i32
    %30 = arith.muli %arg0, %c128_i32 : i32
    %31 = tpu.iota {dimensions = array<i32: 0>} : vector<128x256xi32>
    %32 = vector.broadcast %30 : i32 to vector<128x256xi32>
    %33 = arith.addi %32, %31 : vector<128x256xi32>
    %34 = tpu.iota {dimensions = array<i32: 1>} : vector<128x256xi32>
    %35 = arith.cmpi eq, %33, %34 : vector<128x256xi32>
    %cst_16 = arith.constant 0.000000e+00 : f32
    %36 = vector.broadcast %cst_16 : f32 to vector<128x256xf32>
    %37 = arith.select %35, %21, %36 : vector<128x256xi1>, vector<128x256xf32>
    %38 = vector.shape_cast %37 : vector<128x256xf32> to vector<1x128x256xf32>
    %cst_17 = arith.constant dense<0.000000e+00> : vector<1xf32>
    %39 = vector.multi_reduction <add>, %38, %cst_17 [1, 2] : vector<1x128x256xf32> to vector<1xf32>
    %40 = vector.shape_cast %39 : vector<1xf32> to vector<1x1x1xf32>
    %41 = vector.extract %40[0, 0, 0] : f32 from vector<1x1x1xf32>
    %cst_18 = arith.constant 2.000000e+00 : f32
    %42 = arith.mulf %cst_18, %41 : f32
    %43 = arith.subf %29, %42 : f32
    %cst_19 = arith.constant 1.280000e+02 : f32
    %44 = arith.addf %43, %cst_19 : f32
    %45 = vector.broadcast %44 : f32 to vector<8x128xf32>
    %c0_20 = arith.constant 0 : index
    %c0_21 = arith.constant 0 : index
    %46 = vector.load %arg7[%c0_20, %c0_21] : memref<8x128xf32, #tpu.memory_space<vmem>>, vector<8x128xf32>
    tpu.vector_store %arg7[%c0_20, %c0_21], %45 {strides = array<i32>} : memref<8x128xf32, #tpu.memory_space<vmem>>, vector<8x128xf32>,
    return
  }
  func.func @transform_0(%arg0: i32) -> (i32, i32) {
    %c0_i32 = arith.constant 0 : i32
    %c0_i32_0 = arith.constant 0 : i32
    return %arg0, %c0_i32 : i32, i32
  }
  func.func @transform_1(%arg0: i32) -> (i32, i32) {
    %c0_i32 = arith.constant 0 : i32
    %c0_i32_0 = arith.constant 0 : i32
    return %c0_i32, %arg0 : i32, i32
  }
  func.func @transform_2(%arg0: i32) -> (i32, i32) {
    %c0_i32 = arith.constant 0 : i32
    %c0_i32_0 = arith.constant 0 : i32
    %c0_i32_1 = arith.constant 0 : i32
    return %c0_i32, %c0_i32_0 : i32, i32
  }
  func.func @transform_3(%arg0: i32) -> (i32, i32) {
    %c0_i32 = arith.constant 0 : i32
    %c0_i32_0 = arith.constant 0 : i32
    return %arg0, %c0_i32 : i32, i32
  }
  func.func @transform_4(%arg0: i32) -> (i32, i32) {
    %c0_i32 = arith.constant 0 : i32
    %c0_i32_0 = arith.constant 0 : i32
    %c0_i32_1 = arith.constant 0 : i32
    return %c0_i32, %c0_i32_0 : i32, i32
  }
  func.func @transform_5(%arg0: i32) -> (i32, i32) {
    %c0_i32 = arith.constant 0 : i32
    %c0_i32_0 = arith.constant 0 : i32
    return %arg0, %c0_i32 : i32, i32
  }
  func.func @transform_6(%arg0: i32) -> (i32, i32) {
    %c0_i32 = arith.constant 0 : i32
    %c0_i32_0 = arith.constant 0 : i32
    return %c0_i32, %arg0 : i32, i32
  }
}

</mosaic_0001>

<bundles_post_ra>
// kernel: gcn_forward.3
= control target key start
LH: loop header
LB: loop body
LE: loop exit
PB: predicated region body
PF: predicated region fallthrough
CT: control target
= control target key end

     0   :  { %s832_s12 = smov 0   ;;  %s957_s0 = inlined_call_operand.vmem [shape: f32[256,32], index: 0, kind: input, shape index: {}]   ;;  %s958_s1 = inlined_call_operand.vmem [shape: f32[256,1], index: 1, kind: input, shape index: {}]   ;;  %s959_s2 = inlined_call_operand.vmem [shape: f32[32,16], index: 2, kind: input, shape index: {}]   ;;  %s960_s3 = inlined_call_operand.vmem [shape: bf16[256,16], index: 3, kind: output, shape index: {}]  }
   0x1 LB: > { %s671_s13 = sadd.s32 4294967295, %s809_s12   ;;  %p675_p0 = scmp.ge.s32.totalorder %s809_s12, 1  ;;  %s809_s12 = sphi %s832_s12, %s13_s12  }
   0x2   : > { %p149_p1 = scmp.lt.s32.totalorder %s809_s12, 3 }
   0x4   : > { %p150_p2 = pnand %p675_p0, %p149_p1 }
   0x5   : > { %s676_s18 = sshll.u32 (!%p150_p2), %s671_s13, 4 }
   0x6   : > { %153 = sbr.rel (%p150_p2) target bundleno = 233 (0xe9), region = 32  ;;  %p179_p3 = scmp.lt.s32.totalorder (!%p150_p2), %s676_s18, 31 }
   0xb   : > { %v215_v0 = vld [vmem:[%s959_s2 + $0x18] sm:$0xff]  ;;  %v214_v1 = vld [vmem:[%s959_s2 + $0x10] sm:$0xff]  ;;  %v213_v2 = vld [vmem:[%s959_s2 + $0x8] sm:$0xff]  ;;  %s962_s18 = smov (!%p179_p3, %s676_s18), 31  ;;  %vm216_vm0 = vcmask 261120   ;;  %v811_v14 = vmov 0  }
   0xc   : > { %752 = vmatprep.subr.mxu0 %v215_v0  ;;  %784 = vmatprep.subr.mxu1 %v215_v0  ;;  %v212_v3 = vld [vmem:[%s959_s2] sm:$0xff]  ;;  %s677_s23 = sshll.u32 %s962_s18, 3  ;;  %s681_s30 = sshll.u32 %s962_s18, 2  ;;  %vm586_vm1 = vcmask 125952  }
   0xd   : > { %753 = vmatpush3.msra.mxu0 %v215_v0  ;;  %788 = vmatpush3.msra.mxu1 %v215_v0  ;;  %s858_s26 = scalar_lea.vmem %s957_s0, %s677_s23  ;;  %s871_s29 = scalar_lea.vmem %s958_s1, %s677_s23 }
   0xe   : > { %754 = vmatprep.subr.mxu0 %v214_v1  ;;  %785 = vmatprep.subr.mxu1 %v214_v1  ;;  %v196_v4 = vld [vmem:[%s858_s26] sm:$0xff]  ;;  %v197_v6 = vld [vmem:[%s858_s26 + $0x8] sm:$0xff]  ;;  %v198_v8 = vld [vmem:[%s858_s26 + $0x10] sm:$0xff]  ;;  %s919_s6 = scalar_lea.vmem %s960_s3, %s681_s30 }
   0xf   : > { %755 = vmatpush3.msra.mxu0 %v214_v1  ;;  %789 = vmatpush3.msra.mxu1 %v214_v1  ;;  %v204_v5 = vld [vmem:[%s858_s26 + $0x40] sm:$0xff]  ;;  %v205_v7 = vld [vmem:[%s858_s26 + $0x48] sm:$0xff]  ;;  %v206_v9 = vld [vmem:[%s858_s26 + $0x50] sm:$0xff] }
  0x10   : > { %756 = vmatprep.subr.mxu0 %v213_v2  ;;  %786 = vmatprep.subr.mxu1 %v213_v2  ;;  %v199_v10 = vld [vmem:[%s858_s26 + $0x18] sm:$0xff]  ;;  %v200_v12 = vld [vmem:[%s858_s26 + $0x20] sm:$0xff]  ;;  %v412_v15 = vld [vmem:[%s871_s29 + $0x10] sm:$0xff] }
  0x11   : > { %757 = vmatpush3.msra.mxu0 %v213_v2  ;;  %790 = vmatpush3.msra.mxu1 %v213_v2  ;;  %v207_v11 = vld [vmem:[%s858_s26 + $0x58] sm:$0xff]  ;;  %v208_v13 = vld [vmem:[%s858_s26 + $0x60] sm:$0xff]  ;;  %v411_v18 = vld [vmem:[%s871_s29 + $0x8] sm:$0xff] }
  0x12   : > { %758 = vmatprep.subr.mxu0 %v212_v3  ;;  %787 = vmatprep.subr.mxu1 %v212_v3  ;;  %v410_v16 = vld [vmem:[%s871_s29] sm:$0xff]  ;;  %v413_v17 = vld [vmem:[%s871_s29 + $0x18] sm:$0xff]  ;;  %v201_v19 = vld [vmem:[%s858_s26 + $0x28] sm:$0xff] }
  0x13   : > { %759 = vmatpush3.msra.mxu0 %v212_v3  ;;  %791 = vmatpush3.msra.mxu1 %v212_v3  ;;  %v209_v20 = vld [vmem:[%s858_s26 + $0x68] sm:$0xff]  ;;  %v202_v21 = vld [vmem:[%s858_s26 + $0x30] sm:$0xff]  ;;  %v414_v24 = vld [vmem:[%s871_s29 + $0x20] sm:$0xff] }
  0x14   : > { %760 = vmatprep.mubr.msk.f32.mxu0 %vm216_vm0, %v196_v4  ;;  %772 = vmatprep.mubr.msk.f32.mxu1 %vm216_vm0, %v204_v5  ;;  %v210_v22 = vld [vmem:[%s858_s26 + $0x70] sm:$0xff]  ;;  %v415_v23 = vld [vmem:[%s871_s29 + $0x28] sm:$0xff]  ;;  %v203_v25 = vld [vmem:[%s858_s26 + $0x38] sm:$0xff] }
  0x15   : > { %761 = vmatmul.mubr.msk.f32.vlgmr.msra.gmra.mxu0 %vm216_vm0, %v197_v6  ;;  %773 = vmatmul.mubr.msk.f32.vlgmr.msra.gmra.mxu1 %vm216_vm0, %v205_v7  ;;  %v211_v26 = vld [vmem:[%s858_s26 + $0x78] sm:$0xff]  ;;  %v416_v28 = vld [vmem:[%s871_s29 + $0x30] sm:$0xff]  ;;  %v419_v29 = vld [vmem:[%s871_s29 + $0x48] sm:$0xff] }
  0x16   : > { %763 = vmatprep.mubr.msk.f32.mxu0 %vm216_vm0, %v198_v8  ;;  %775 = vmatprep.mubr.msk.f32.mxu1 %vm216_vm0, %v206_v9  ;;  %v417_v27 = vld [vmem:[%s871_s29 + $0x38] sm:$0xff]  ;;  %v418_v30 = vld [vmem:[%s871_s29 + $0x40] sm:$0xff]  ;;  %v420_v32 = vld [vmem:[%s871_s29 + $0x50] sm:$0xff] }
  0x17   : > { %802 = vset.pattern.permute.xlu1 %v811_v14  ;;  %801 = vset.pattern.permute.xlu0 %v811_v14  ;;  %v421_v31 = vld [vmem:[%s871_s29 + $0x58] sm:$0xff]  ;;  %v423_v33 = vld [vmem:[%s871_s29 + $0x68] sm:$0xff]  ;;  %v422_v34 = vld [vmem:[%s871_s29 + $0x60] sm:$0xff] }
  0x18   : > { %438 = vperm.xlu1 %802, %v412_v15   ;;  %428 = vperm.xlu0 %801, %v410_v16   ;;  %v425_v35 = vld [vmem:[%s871_s29 + $0x78] sm:$0xff]  ;;  %v424_v36 = vld [vmem:[%s871_s29 + $0x70] sm:$0xff] }
  0x19   : > { %764 = vmatmul.mubr.msk.f32.gmra.mxu0 %vm216_vm0, %v199_v10  ;;  %776 = vmatmul.mubr.msk.f32.gmra.mxu1 %vm216_vm0, %v207_v11 }
  0x1a   : > { %766 = vmatprep.mubr.msk.f32.mxu0 %vm216_vm0, %v200_v12  ;;  %778 = vmatprep.mubr.msk.f32.mxu1 %vm216_vm0, %v208_v13 }
  0x1c   : > { %443 = vperm.xlu1 %802, %v413_v17   ;;  %433 = vperm.xlu0 %801, %v411_v18  }
  0x1d   : > { %767 = vmatmul.mubr.msk.f32.gmra.mxu0 %vm216_vm0, %v201_v19  ;;  %779 = vmatmul.mubr.msk.f32.gmra.mxu1 %vm216_vm0, %v209_v20 }
  0x1e   : > { %769 = vmatprep.mubr.msk.f32.mxu0 %vm216_vm0, %v202_v21  ;;  %781 = vmatprep.mubr.msk.f32.mxu1 %vm216_vm0, %v210_v22 }
  0x20   : > { %453 = vperm.xlu1 %802, %v415_v23   ;;  %448 = vperm.xlu0 %801, %v414_v24  }
  0x21   : > { %770 = vmatmul.mubr.msk.f32.gmra.mxu0 %vm216_vm0, %v203_v25  ;;  %782 = vmatmul.mubr.msk.f32.gmra.mxu1 %vm216_vm0, %v211_v26 }
  0x24   : > { %463 = vperm.xlu1 %802, %v417_v27   ;;  %458 = vperm.xlu0 %801, %v416_v28  }
  0x28   : > { %473 = vperm.xlu1 %802, %v419_v29   ;;  %468 = vperm.xlu0 %801, %v418_v30  }
  0x2c   : > { %483 = vperm.xlu1 %802, %v421_v31   ;;  %478 = vperm.xlu0 %801, %v420_v32  }
  0x30   : > { %493 = vperm.xlu1 %802, %v423_v33   ;;  %488 = vperm.xlu0 %801, %v422_v34  }
  0x34   : > { %503 = vperm.xlu1 %802, %v425_v35   ;;  %498 = vperm.xlu0 %801, %v424_v36  }
  0x93   : > { %v439_v37 = vpop.permute.xlu1 %438  ;;  %v429_v38 = vpop.permute.xlu0 %428 }
  0x97   : > { %v444_v39 = vpop.permute.xlu1 %443  ;;  %v434_v40 = vpop.permute.xlu0 %433 }
  0x9b   : > { %v454_v41 = vpop.permute.xlu1 %453  ;;  %v449_v42 = vpop.permute.xlu0 %448 }
  0x9f   : > { %v464_v43 = vpop.permute.xlu1 %463  ;;  %v913_v44 = vpop.permute.xlu0 %458 }
  0xa3   : > { %v474_v45 = vpop.permute.xlu1 %473  ;;  %v469_v46 = vpop.permute.xlu0 %468 }
  0xa7   : > { %v484_v47 = vpop.permute.xlu1 %483  ;;  %v479_v50 = vpop.permute.xlu0 %478 }
  0xab   : > { %v494_v61 = vpop.permute.xlu1 %493  ;;  %v489_v4 = vpop.permute.xlu0 %488 }
  0xaf   : > { %v504_v17 = vpop.permute.xlu1 %503  ;;  %v499_v24 = vpop.permute.xlu0 %498 }
  0xd5   : > { %v762_v48 = vpop.f32.mrf.mxu0  ;;  %v774_v49 = vpop.f32.mrf.mxu1 }
  0xd6   : > { %v507_v51 = vmul.f32 %v762_v48, %v434_v40  ;;  %v515_v52 = vmul.f32 %v774_v49, %v474_v45 }
  0xd7   : > { %v331_v53 = vpop.f32.mrf.mxu0  ;;  %v371_v54 = vpop.f32.mrf.mxu1 }
  0xd8   : > { %v717_v55 = vpack.c.bf16 %v507_v51, %v507_v51  ;;  %v725_v56 = vpack.c.bf16 %v515_v52, %v515_v52  ;;  %v506_v57 = vmul.f32 %v429_v38, %v331_v53  ;;  %v514_v58 = vmul.f32 %v469_v46, %v371_v54 }
  0xd9   : > { %v765_v59 = vpop.f32.mrf.mxu0  ;;  %v777_v60 = vpop.f32.mrf.mxu1 }
  0xda   : > { %588 = vst.msk [vmem:[%s919_s6 + $0x4] sm:$0xf] %vm586_vm1, %v717_v55  ;;  %596 = vst.msk [vmem:[%s919_s6 + $0x24] sm:$0xf] %vm586_vm1, %v725_v56  ;;  %v716_v62 = vpack.c.bf16 %v506_v57, %v506_v57  ;;  %v724_v63 = vpack.c.bf16 %v514_v58, %v514_v58  ;;  %v509_v0 = vmul.f32 %v765_v59, %v444_v39 }
  0xdb   : > { %v517_v1 = vmul.f32 %v777_v60, %v484_v47  ;;  %v341_v2 = vpop.f32.mrf.mxu0  ;;  %v381_v3 = vpop.f32.mrf.mxu1 }
  0xdc   : > { %587 = vst.msk [vmem:[%s919_s6] sm:$0xf] %vm586_vm1, %v716_v62  ;;  %595 = vst.msk [vmem:[%s919_s6 + $0x20] sm:$0xf] %vm586_vm1, %v724_v63  ;;  %v719_v5 = vpack.c.bf16 %v509_v0, %v509_v0  ;;  %v508_v7 = vmul.f32 %v439_v37, %v341_v2  ;;  %v516_v8 = vmul.f32 %v479_v50, %v381_v3 }
  0xdd   : > { %v727_v6 = vpack.c.bf16 %v517_v1, %v517_v1  ;;  %v768_v9 = vpop.f32.mrf.mxu0  ;;  %v780_v10 = vpop.f32.mrf.mxu1 }
  0xde   : > { %590 = vst.msk [vmem:[%s919_s6 + $0xc] sm:$0xf] %vm586_vm1, %v719_v5  ;;  %v718_v11 = vpack.c.bf16 %v508_v7, %v508_v7  ;;  %v726_v12 = vpack.c.bf16 %v516_v8, %v516_v8  ;;  %v511_v13 = vmul.f32 %v768_v9, %v454_v41  ;;  %v519_v14 = vmul.f32 %v780_v10, %v494_v61 }
  0xdf   : > { %598 = vst.msk [vmem:[%s919_s6 + $0x2c] sm:$0xf] %vm586_vm1, %v727_v6  ;;  %v351_v15 = vpop.f32.mrf.mxu0  ;;  %v391_v16 = vpop.f32.mrf.mxu1 }
  0xe0   : > { %589 = vst.msk [vmem:[%s919_s6 + $0x8] sm:$0xf] %vm586_vm1, %v718_v11  ;;  %597 = vst.msk [vmem:[%s919_s6 + $0x28] sm:$0xf] %vm586_vm1, %v726_v12  ;;  %v721_v18 = vpack.c.bf16 %v511_v13, %v511_v13  ;;  %v729_v19 = vpack.c.bf16 %v519_v14, %v519_v14  ;;  %v510_v20 = vmul.f32 %v449_v42, %v351_v15 }
  0xe1   : > { %v518_v21 = vmul.f32 %v489_v4, %v391_v16  ;;  %v771_v22 = vpop.f32.mrf.mxu0  ;;  %v783_v23 = vpop.f32.mrf.mxu1 }
  0xe2   : > { %592 = vst.msk [vmem:[%s919_s6 + $0x14] sm:$0xf] %vm586_vm1, %v721_v18  ;;  %600 = vst.msk [vmem:[%s919_s6 + $0x34] sm:$0xf] %vm586_vm1, %v729_v19  ;;  %v720_v25 = vpack.c.bf16 %v510_v20, %v510_v20  ;;  %v513_v27 = vmul.f32 %v771_v22, %v464_v43  ;;  %v521_v28 = vmul.f32 %v783_v23, %v504_v17 }
  0xe3   : > { %v728_v26 = vpack.c.bf16 %v518_v21, %v518_v21  ;;  %v361_v29 = vpop.f32.mrf.mxu0  ;;  %v401_v30 = vpop.f32.mrf.mxu1 }
  0xe4   : > { %591 = vst.msk [vmem:[%s919_s6 + $0x10] sm:$0xf] %vm586_vm1, %v720_v25  ;;  %v723_v31 = vpack.c.bf16 %v513_v27, %v513_v27  ;;  %v731_v32 = vpack.c.bf16 %v521_v28, %v521_v28  ;;  %v512_v33 = vmul.f32 %v913_v44, %v361_v29  ;;  %v520_v34 = vmul.f32 %v499_v24, %v401_v30 }
  0xe5   : > { %599 = vst.msk [vmem:[%s919_s6 + $0x30] sm:$0xf] %vm586_vm1, %v728_v26 }
  0xe6   : > { %594 = vst.msk [vmem:[%s919_s6 + $0x1c] sm:$0xf] %vm586_vm1, %v723_v31  ;;  %602 = vst.msk [vmem:[%s919_s6 + $0x3c] sm:$0xf] %vm586_vm1, %v731_v32  ;;  %v722_v35 = vpack.c.bf16 %v512_v33, %v512_v33  ;;  %v730_v36 = vpack.c.bf16 %v520_v34, %v520_v34 }
  0xe8   : > { %593 = vst.msk [vmem:[%s919_s6 + $0x18] sm:$0xf] %vm586_vm1, %v722_v35  ;;  %601 = vst.msk [vmem:[%s919_s6 + $0x38] sm:$0xf] %vm586_vm1, %v730_v36 }
  0xe9 PF: > { %s13_s12 = sadd.s32 1, %s809_s12  }
  0xea   : > { %p10_p4 = scmp.ge.s32.totalorder %s13_s12, 4  }
  0xec   :  { %12 = sbr.rel (!%p10_p4) target bundleno = 1 (0x1), region = 65 }

// kernel: gcn_forward.4
= control target key start
LH: loop header
LB: loop body
LE: loop exit
PB: predicated region body
PF: predicated region fallthrough
CT: control target
= control target key end

     0   :  { %s1399_s18 = smov 0   ;;  %s1648_s0 = inlined_call_operand.vmem [shape: bf16[256,256], index: 0, kind: input, shape index: {}]   ;;  %s1649_s1 = inlined_call_operand.vmem [shape: bf16[256,16], index: 1, kind: input, shape index: {}]   ;;  %s1650_s2 = inlined_call_operand.vmem [shape: f32[256,1], index: 2, kind: input, shape index: {}]   ;;  %s1651_s3 = inlined_call_operand.vmem [shape: f32[1,16], index: 3, kind: input, shape index: {}]   ;;  %s1652_s4 = inlined_call_operand.vmem [shape: f32[16,8], index: 4, kind: input, shape index: {}]   ;;  %s1653_s5 = inlined_call_operand.vmem [shape: bf16[256,8], index: 5, kind: output, shape index: {}]  }
   0x1 LB: > { %s1087_s19 = sadd.s32 4294967295, %s1366_s18   ;;  %p1091_p0 = scmp.ge.s32.totalorder %s1366_s18, 1  ;;  %s1366_s18 = sphi %s1399_s18, %s15_s18  }
   0x2   : > { %p200_p1 = scmp.lt.s32.totalorder %s1366_s18, 3 }
   0x4   : > { %p201_p2 = pnand %p1091_p0, %p200_p1 }
   0x5   : > { %s1092_s22 = sshll.u32 (!%p201_p2), %s1087_s19, 4 }
   0x6   : > { %204 = sbr.rel (%p201_p2) target bundleno = 499 (0x1f3), region = 40  ;;  %p235_p3 = scmp.lt.s32.totalorder (!%p201_p2), %s1092_s22, 31 }
   0xb   : > { %v1320_v0 = vld [vmem:[%s1649_s1 + $0x78] sm:$0xff]   ;;  %v1322_v2 = vld [vmem:[%s1649_s1 + $0x70] sm:$0xff]   ;;  %v1324_v4 = vld [vmem:[%s1649_s1 + $0x68] sm:$0xff]   ;;  %v1368_v5 = vmov 0   ;;  %s1655_s22 = smov (!%p235_p3, %s1092_s22), 31  ;;  %vm728_vm0 = vcmask 130048  }
   0xc   : > { %v1321_v1 = vld [vmem:[%s1649_s1 + $0x38] sm:$0xff]   ;;  %1183 = vmatprep.subr.bf16.mxu0 %v1320_v0  ;;  %1293 = vmatprep.subr.bf16.mxu1 %v1320_v0  ;;  %v1323_v3 = vld [vmem:[%s1649_s1 + $0x30] sm:$0xff]   ;;  %v1325_v6 = vld [vmem:[%s1649_s1 + $0x28] sm:$0xff]   ;;  %s1166_s12 = sshll.u32 %s1655_s22, 3  ;;  %s1098_s19 = sshll.u32 %s1655_s22, 2  ;;  %vm1002_vm1 = vcmask 60416  }
   0xd   : > { %1184 = vmatpush3.bf16.msra.mxu0 %v1321_v1  ;;  %1301 = vmatpush3.bf16.msra.mxu1 %v1321_v1  ;;  %v1326_v7 = vld [vmem:[%s1649_s1 + $0x60] sm:$0xff]   ;;  %v1328_v9 = vld [vmem:[%s1649_s1 + $0x58] sm:$0xff]   ;;  %s1440_s17 = scalar_lea.vmem %s1648_s0, %s1166_s12  ;;  %v1330_v11 = vld [vmem:[%s1649_s1 + $0x50] sm:$0xff]   ;;  %s1462_s7 = scalar_lea.vmem %s1650_s2, %s1166_s12 }
   0xe   : > { %1185 = vmatprep.subr.bf16.mxu0 %v1322_v2  ;;  %1294 = vmatprep.subr.bf16.mxu1 %v1322_v2  ;;  %v1327_v8 = vld [vmem:[%s1649_s1 + $0x20] sm:$0xff]   ;;  %v1329_v10 = vld [vmem:[%s1649_s1 + $0x18] sm:$0xff]   ;;  %v1331_v13 = vld [vmem:[%s1649_s1 + $0x10] sm:$0xff]   ;;  %s1596_s23 = scalar_lea.vmem %s1653_s5, %s1098_s19 }
   0xf   : > { %1318 = vset.pattern.permute.xlu0 %v1368_v5  ;;  %1319 = vset.pattern.permute.xlu1 %v1368_v5  ;;  %v1338_v12 = vld [vmem:[%s1440_s17 + $0x4] ss:$8 sps:$4 sm:$0xff]   ;;  %v577_v20 = vld [vmem:[%s1462_s7 + $0x10] sm:$0xff]  ;;  %v1336_v21 = vld [vmem:[%s1440_s17] ss:$8 sps:$4 sm:$0xff]  }
  0x10   : > { %v1344_v14 = vld [vmem:[%s1440_s17 + $0x64] ss:$8 sps:$4 sm:$0xff]   ;;  %510 = vmatprep.mubr.bf16.mxu0 %v1338_v12  ;;  %603 = vperm.xlu1 %1319, %v577_v20   ;;  %v1342_v22 = vld [vmem:[%s1440_s17 + $0x60] ss:$8 sps:$4 sm:$0xff]   ;;  %v578_v24 = vld [vmem:[%s1462_s7 + $0x18] sm:$0xff] }
  0x11   : > { %1186 = vmatpush3.bf16.msra.mxu0 %v1323_v3  ;;  %1302 = vmatpush3.bf16.msra.mxu1 %v1323_v3  ;;  %v1332_v15 = vld [vmem:[%s1649_s1 + $0x48] sm:$0xff]   ;;  %v1334_v17 = vld [vmem:[%s1649_s1 + $0x40] sm:$0xff]   ;;  %v1339_v25 = vld [vmem:[%s1440_s17 + $0x14] ss:$8 sps:$4 sm:$0xff]  }
  0x12   : > { %1187 = vmatprep.subr.bf16.mxu0 %v1324_v4  ;;  %1295 = vmatprep.subr.bf16.mxu1 %v1324_v4  ;;  %v1333_v16 = vld [vmem:[%s1649_s1 + $0x8] sm:$0xff]   ;;  %v575_v18 = vld [vmem:[%s1462_s7] sm:$0xff]  ;;  %v1348_v26 = vld [vmem:[%s1440_s17 + $0x74] ss:$8 sps:$4 sm:$0xff]  }
  0x13   : > { %558 = vmatprep.mubr.bf16.mxu1 %v1344_v14  ;;  %v1335_v19 = vld [vmem:[%s1649_s1] sm:$0xff]   ;;  %593 = vperm.xlu0 %1318, %v575_v18   ;;  %v576_v23 = vld [vmem:[%s1462_s7 + $0x8] sm:$0xff]  ;;  %v1341_v29 = vld [vmem:[%s1440_s17 + $0x10] ss:$8 sps:$4 sm:$0xff]  }
  0x14   : > { %608 = vperm.xlu1 %1319, %v578_v24   ;;  %v579_v27 = vld [vmem:[%s1462_s7 + $0x20] sm:$0xff]  ;;  %v580_v28 = vld [vmem:[%s1462_s7 + $0x28] sm:$0xff]  ;;  %v1350_v30 = vld [vmem:[%s1440_s17 + $0x70] ss:$8 sps:$4 sm:$0xff]  }
  0x15   : > { %1188 = vmatpush3.bf16.msra.mxu0 %v1325_v6  ;;  %1303 = vmatpush3.bf16.msra.mxu1 %v1325_v6  ;;  %v581_v31 = vld [vmem:[%s1462_s7 + $0x30] sm:$0xff]  ;;  %v582_v32 = vld [vmem:[%s1462_s7 + $0x38] sm:$0xff]  ;;  %v1345_v33 = vld [vmem:[%s1440_s17 + $0x24] ss:$8 sps:$4 sm:$0xff]  }
  0x16   : > { %1189 = vmatprep.subr.bf16.mxu0 %v1326_v7  ;;  %1296 = vmatprep.subr.bf16.mxu1 %v1326_v7  ;;  %v583_v34 = vld [vmem:[%s1462_s7 + $0x40] sm:$0xff]  ;;  %v584_v35 = vld [vmem:[%s1462_s7 + $0x48] sm:$0xff]  ;;  %v585_v37 = vld [vmem:[%s1462_s7 + $0x50] sm:$0xff] }
  0x17   : > { %598 = vperm.xlu0 %1318, %v576_v23   ;;  %v1347_v36 = vld [vmem:[%s1440_s17 + $0x20] ss:$8 sps:$4 sm:$0xff]   ;;  %v586_v38 = vld [vmem:[%s1462_s7 + $0x58] sm:$0xff]  ;;  %v589_v43 = vld [vmem:[%s1462_s7 + $0x70] sm:$0xff] }
  0x18   : > { %618 = vperm.xlu1 %1319, %v580_v28   ;;  %v1351_v39 = vld [vmem:[%s1440_s17 + $0x34] ss:$8 sps:$4 sm:$0xff]   ;;  %v587_v40 = vld [vmem:[%s1462_s7 + $0x60] sm:$0xff]  ;;  %v588_v41 = vld [vmem:[%s1462_s7 + $0x68] sm:$0xff] }
  0x19   : > { %1190 = vmatpush3.bf16.msra.mxu0 %v1327_v8  ;;  %1304 = vmatpush3.bf16.msra.mxu1 %v1327_v8  ;;  %v1353_v42 = vld [vmem:[%s1440_s17 + $0x30] ss:$8 sps:$4 sm:$0xff]   ;;  %v1354_v45 = vld [vmem:[%s1440_s17 + $0x44] ss:$8 sps:$4 sm:$0xff]   ;;  %v1356_v46 = vld [vmem:[%s1440_s17 + $0x40] ss:$8 sps:$4 sm:$0xff]  }
  0x1a   : > { %1191 = vmatprep.subr.bf16.mxu0 %v1328_v9  ;;  %1297 = vmatprep.subr.bf16.mxu1 %v1328_v9  ;;  %v590_v44 = vld [vmem:[%s1462_s7 + $0x78] sm:$0xff]  ;;  %v727_v49 = vld [vmem:[%s1652_s4 + $0x8] sm:$0xff]  ;;  %v726_v50 = vld [vmem:[%s1652_s4] sm:$0xff] }
  0x1b   : > { %613 = vperm.xlu0 %1318, %v579_v27   ;;  %v1357_v47 = vld [vmem:[%s1440_s17 + $0x54] ss:$8 sps:$4 sm:$0xff]   ;;  %v1359_v48 = vld [vmem:[%s1440_s17 + $0x50] ss:$8 sps:$4 sm:$0xff]   ;;  %v1511_v55 = vld [vmem:[%s1651_s3] ss:$0 sm:$0xff] }
  0x1c   : > { %628 = vperm.xlu1 %1319, %v582_v32  }
  0x1d   : > { %1192 = vmatpush3.bf16.msra.mxu0 %v1329_v10  ;;  %1305 = vmatpush3.bf16.msra.mxu1 %v1329_v10 }
  0x1e   : > { %1193 = vmatprep.subr.bf16.mxu0 %v1330_v11  ;;  %1298 = vmatprep.subr.bf16.mxu1 %v1330_v11 }
  0x1f   : > { %623 = vperm.xlu0 %1318, %v581_v31  }
  0x20   : > { %638 = vperm.xlu1 %1319, %v584_v35  }
  0x21   : > { %1194 = vmatpush3.bf16.msra.mxu0 %v1331_v13  ;;  %1306 = vmatpush3.bf16.msra.mxu1 %v1331_v13 }
  0x22   : > { %1195 = vmatprep.subr.bf16.mxu0 %v1332_v15  ;;  %1299 = vmatprep.subr.bf16.mxu1 %v1332_v15 }
  0x23   : > { %633 = vperm.xlu0 %1318, %v583_v34  }
  0x24   : > { %648 = vperm.xlu1 %1319, %v586_v38  }
  0x25   : > { %1196 = vmatpush3.bf16.msra.mxu0 %v1333_v16  ;;  %1307 = vmatpush3.bf16.msra.mxu1 %v1333_v16 }
  0x26   : > { %1197 = vmatprep.subr.bf16.mxu0 %v1334_v17  ;;  %1300 = vmatprep.subr.bf16.mxu1 %v1334_v17 }
  0x27   : > { %643 = vperm.xlu0 %1318, %v585_v37  }
  0x28   : > { %658 = vperm.xlu1 %1319, %v588_v41  }
  0x29   : > { %1198 = vmatpush3.bf16.msra.mxu0 %v1335_v19  ;;  %1308 = vmatpush3.bf16.msra.mxu1 %v1335_v19 }
  0x2a   : > { %1265 = vmatprep.subr.mxu1 %v727_v49 }
  0x2b   : > { %653 = vperm.xlu0 %1318, %v587_v40  }
  0x2c   : > { %511 = vmatmul.mubr.bf16.vlgmr.msra.gmra.mxu0 %v1336_v21  ;;  %559 = vmatmul.mubr.bf16.vlgmr.msra.gmra.mxu1 %v1342_v22 }
  0x2d   : > { %518 = vmatprep.mubr.bf16.mxu0 %v1339_v25  ;;  %566 = vmatprep.mubr.bf16.mxu1 %v1348_v26 }
  0x2e   : > { %668 = vperm.xlu1 %1319, %v590_v44   ;;  %1266 = vmatpush3.msra.mxu1 %v727_v49 }
  0x2f   : > { %663 = vperm.xlu0 %1318, %v589_v43   ;;  %1267 = vmatprep.subr.mxu1 %v726_v50 }
  0x30   : > { %1268 = vmatpush3.msra.mxu1 %v726_v50 }
  0x34   : > { %519 = vmatmul.mubr.bf16.gmra.mxu0 %v1341_v29  ;;  %567 = vmatmul.mubr.bf16.gmra.mxu1 %v1350_v30 }
  0x35   : > { %526 = vmatprep.mubr.bf16.mxu0 %v1345_v33 }
  0x3c   : > { %527 = vmatmul.mubr.bf16.gmra.mxu0 %v1347_v36 }
  0x3d   : > { %534 = vmatprep.mubr.bf16.mxu0 %v1351_v39 }
  0x44   : > { %535 = vmatmul.mubr.bf16.gmra.mxu0 %v1353_v42 }
  0x45   : > { %542 = vmatprep.mubr.bf16.mxu0 %v1354_v45 }
  0x4c   : > { %543 = vmatmul.mubr.bf16.gmra.mxu0 %v1356_v46 }
  0x4d   : > { %550 = vmatprep.mubr.bf16.mxu0 %v1357_v47 }
  0x54   : > { %551 = vmatmul.mubr.bf16.gmra.mxu0 %v1359_v48 }
  0x8b   : > { %v1514_v59 = vpop.permute.xlu1 %603 }
  0x8e   : > { %v1506_v52 = vpop.permute.xlu0 %593 }
  0x8f   : > { %v1522_v6 = vpop.permute.xlu1 %608 }
  0x92   : > { %v1517_v62 = vpop.permute.xlu0 %598 }
  0x93   : > { %v1530_v18 = vpop.permute.xlu1 %618 }
  0x96   : > { %v1527_v13 = vpop.permute.xlu0 %613 }
  0x97   : > { %v1539_v30 = vpop.permute.xlu1 %628 }
  0x9a   : > { %v1535_v26 = vpop.permute.xlu0 %623 }
  0x9b   : > { %v1547_v43 = vpop.permute.xlu1 %638 }
  0x9e   : > { %v1544_v38 = vpop.permute.xlu0 %633 }
  0xec   : > { %v1199_v51 = vpop.f32.mrf.mxu0  ;;  %v1235_v16 = vpop.f32.mrf.mxu1 }
  0xee   : > { %v1200_v53 = vpop.f32.mrf.mxu0  ;;  %v1236_v24 = vpop.f32.mrf.mxu1 }
  0xef   : > { %v1201_v54 = vadd.f32 %v1200_v53, %v1199_v51  ;;  %v1552_v51 = vpop.permute.xlu0 %643 }
  0xf0   : > { %v1202_v56 = vpop.f32.mrf.mxu0  ;;  %v1238_v33 = vpop.f32.mrf.mxu1 }
  0xf1   : > { %v671_v57 = vmul.f32 %v1201_v54, %v1506_v52 }
  0xf2   : > { %v1203_v58 = vpop.f32.mrf.mxu0  ;;  %v1239_v41 = vpop.f32.mrf.mxu1 }
  0xf3   : > { %v694_v60 = vadd.f32 %v1511_v55, %v671_v57  ;;  %v1204_v61 = vadd.f32 %v1203_v58, %v1202_v56  ;;  %v1556_v57 = vpop.permute.xlu1 %648 }
  0xf4   : > { %v1205_v63 = vpop.f32.mrf.mxu0  ;;  %v1241_v49 = vpop.f32.mrf.mxu1 }
  0xf5   : > { %v710_v0 = vmax.f32 %v694_v60, 0.0  ;;  %v672_v1 = vmul.f32 %v1204_v61, %v1517_v62 }
  0xf6   : > { %v1206_v2 = vpop.f32.mrf.mxu0  ;;  %v1242_v61 = vpop.f32.mrf.mxu1 }
  0xf7   : > { %v695_v3 = vadd.f32 %v1511_v55, %v672_v1  ;;  %v1207_v4 = vadd.f32 %v1206_v2, %v1205_v63  ;;  %1269 = vmatprep.mubr.msk.f32.mxu1 %vm728_vm0, %v710_v0 }
  0xf8   : > { %v1208_v5 = vpop.f32.mrf.mxu0 }
  0xf9   : > { %v711_v7 = vmax.f32 %v695_v3, 0.0  ;;  %v673_v8 = vmul.f32 %v1207_v4, %v1514_v59  ;;  %v1561_v3 = vpop.permute.xlu0 %653 }
  0xfa   : > { %v1209_v9 = vpop.f32.mrf.mxu0 }
  0xfb   : > { %v696_v10 = vadd.f32 %v1511_v55, %v673_v8  ;;  %v1210_v11 = vadd.f32 %v1209_v9, %v1208_v5  ;;  %1270 = vmatmul.mubr.msk.f32.vlgmr.msra.gmra.mxu1 %vm728_vm0, %v711_v7  ;;  %v1237_v7 = vadd.f32 %v1236_v24, %v1235_v16  ;;  %v1244_v8 = vpop.f32.mrf.mxu1 }
  0xfc   : > { %v1211_v12 = vpop.f32.mrf.mxu0 }
  0xfd   : > { %v712_v14 = vmax.f32 %v696_v10, 0.0  ;;  %v674_v15 = vmul.f32 %v1210_v11, %v1522_v6  ;;  %v1570_v16 = vpop.permute.xlu0 %663 }
  0xfe   : > { %v1212_v17 = vpop.f32.mrf.mxu0 }
  0xff   : > { %v697_v19 = vadd.f32 %v1511_v55, %v674_v15  ;;  %v1213_v20 = vadd.f32 %v1212_v17, %v1211_v12  ;;  %1272 = vmatprep.mubr.msk.f32.mxu1 %vm728_vm0, %v712_v14  ;;  %v1566_v12 = vpop.permute.xlu1 %658  ;;  %v1240_v15 = vadd.f32 %v1239_v41, %v1238_v33 }
 0x100   : > { %v1214_v21 = vpop.f32.mrf.mxu0 }
 0x101   : > { %v713_v22 = vmax.f32 %v697_v19, 0.0  ;;  %v675_v23 = vmul.f32 %v1213_v20, %v1527_v13  ;;  %v683_v20 = vmul.f32 %v1237_v7, %v1561_v3 }
 0x102   : > { %v1215_v25 = vpop.f32.mrf.mxu0 }
 0x103   : > { %v698_v27 = vadd.f32 %v1511_v55, %v675_v23  ;;  %v1216_v28 = vadd.f32 %v1215_v25, %v1214_v21  ;;  %1273 = vmatmul.mubr.msk.f32.gmra.mxu1 %vm728_vm0, %v713_v22  ;;  %v1243_v21 = vadd.f32 %v1242_v61, %v1241_v49  ;;  %v1245_v22 = vpop.f32.mrf.mxu1 }
 0x104   : > { %v1217_v29 = vpop.f32.mrf.mxu0 }
 0x105   : > { %v714_v31 = vmax.f32 %v698_v27, 0.0  ;;  %v676_v32 = vmul.f32 %v1216_v28, %v1530_v18  ;;  %v684_v27 = vmul.f32 %v1240_v15, %v1566_v12  ;;  %v1246_v28 = vadd.f32 %v1245_v22, %v1244_v8 }
 0x106   : > { %v1218_v34 = vpop.f32.mrf.mxu0  ;;  %v685_v33 = vmul.f32 %v1243_v21, %v1570_v16 }
 0x107   : > { %v699_v35 = vadd.f32 %v1511_v55, %v676_v32  ;;  %v1219_v36 = vadd.f32 %v1218_v34, %v1217_v29  ;;  %1275 = vmatprep.mubr.msk.f32.mxu1 %vm728_vm0, %v714_v31  ;;  %v706_v32 = vadd.f32 %v1511_v55, %v683_v20  ;;  %v1578_v34 = vpop.permute.xlu1 %668 }
 0x108   : > { %v1220_v37 = vpop.f32.mrf.mxu0  ;;  %v708_v41 = vadd.f32 %v1511_v55, %v685_v33 }
 0x109   : > { %v715_v39 = vmax.f32 %v699_v35, 0.0  ;;  %v677_v40 = vmul.f32 %v1219_v36, %v1535_v26  ;;  %v707_v36 = vadd.f32 %v1511_v55, %v684_v27 }
 0x10a   : > { %v1221_v42 = vpop.f32.mrf.mxu0 }
 0x10b   : > { %v700_v44 = vadd.f32 %v1511_v55, %v677_v40  ;;  %v1222_v45 = vadd.f32 %v1221_v42, %v1220_v37  ;;  %1276 = vmatmul.mubr.msk.f32.gmra.mxu1 %vm728_vm0, %v715_v39  ;;  %v686_v37 = vmul.f32 %v1246_v28, %v1578_v34  ;;  %v722_v40 = vmax.f32 %v706_v32, 0.0 }
 0x10c   : > { %v1223_v46 = vpop.f32.mrf.mxu0  ;;  %v723_v42 = vmax.f32 %v707_v36, 0.0 }
 0x10d   : > { %v716_v47 = vmax.f32 %v700_v44, 0.0  ;;  %v678_v48 = vmul.f32 %v1222_v45, %v1539_v30  ;;  %v709_v44 = vadd.f32 %v1511_v55, %v686_v37  ;;  %v724_v45 = vmax.f32 %v708_v41, 0.0 }
 0x10e   : > { %v1224_v50 = vpop.f32.mrf.mxu0 }
 0x10f   : > { %v701_v53 = vadd.f32 %v1511_v55, %v678_v48  ;;  %v1225_v54 = vadd.f32 %v1224_v50, %v1223_v46  ;;  %1278 = vmatprep.mubr.msk.f32.mxu1 %vm728_vm0, %v716_v47  ;;  %v725_v46 = vmax.f32 %v709_v44, 0.0 }
 0x110   : > { %v1226_v56 = vpop.f32.mrf.mxu0 }
 0x111   : > { %v717_v58 = vmax.f32 %v701_v53, 0.0  ;;  %v679_v60 = vmul.f32 %v1225_v54, %v1544_v38 }
 0x112   : > { %v1227_v63 = vpop.f32.mrf.mxu0 }
 0x113   : > { %v702_v0 = vadd.f32 %v1511_v55, %v679_v60  ;;  %v1228_v1 = vadd.f32 %v1227_v63, %v1226_v56  ;;  %1279 = vmatmul.mubr.msk.f32.gmra.mxu1 %vm728_vm0, %v717_v58 }
 0x114   : > { %v1229_v2 = vpop.f32.mrf.mxu0 }
 0x115   : > { %v718_v4 = vmax.f32 %v702_v0, 0.0  ;;  %v680_v5 = vmul.f32 %v1228_v1, %v1547_v43 }
 0x116   : > { %v1230_v9 = vpop.f32.mrf.mxu0 }
 0x117   : > { %v703_v10 = vadd.f32 %v1511_v55, %v680_v5  ;;  %v1231_v11 = vadd.f32 %v1230_v9, %v1229_v2  ;;  %1281 = vmatprep.mubr.msk.f32.mxu1 %vm728_vm0, %v718_v4 }
 0x118   : > { %v1232_v14 = vpop.f32.mrf.mxu0 }
 0x119   : > { %v719_v17 = vmax.f32 %v703_v10, 0.0  ;;  %v681_v19 = vmul.f32 %v1231_v11, %v1552_v51 }
 0x11a   : > { %v1233_v23 = vpop.f32.mrf.mxu0 }
 0x11b   : > { %v704_v24 = vadd.f32 %v1511_v55, %v681_v19  ;;  %v1234_v25 = vadd.f32 %v1233_v23, %v1232_v14  ;;  %1282 = vmatmul.mubr.msk.f32.gmra.mxu1 %vm728_vm0, %v719_v17 }
 0x11d   : > { %v720_v29 = vmax.f32 %v704_v24, 0.0  ;;  %v682_v31 = vmul.f32 %v1234_v25, %v1556_v57 }
 0x11f   : > { %v705_v35 = vadd.f32 %v1511_v55, %v682_v31  ;;  %1284 = vmatprep.mubr.msk.f32.mxu1 %vm728_vm0, %v720_v29 }
 0x121   : > { %v721_v39 = vmax.f32 %v705_v35, 0.0 }
 0x123   : > { %1285 = vmatmul.mubr.msk.f32.gmra.mxu1 %vm728_vm0, %v721_v39 }
 0x124   : > { %1287 = vmatprep.mubr.msk.f32.mxu1 %vm728_vm0, %v722_v40 }
 0x127   : > { %1288 = vmatmul.mubr.msk.f32.gmra.mxu1 %vm728_vm0, %v723_v42 }
 0x128   : > { %1290 = vmatprep.mubr.msk.f32.mxu1 %vm728_vm0, %v724_v45 }
 0x12b   : > { %1291 = vmatmul.mubr.msk.f32.gmra.mxu1 %vm728_vm0, %v725_v46 }
 0x1bb   : > { %v1271_v47 = vpop.f32.mrf.mxu1 }
 0x1bc   : > { %v923_v48 = vmul.f32 %v1271_v47, %v1517_v62 }
 0x1bd   : > { %v843_v55 = vpop.f32.mrf.mxu1 }
 0x1be   : > { %v1168_v49 = vpack.c.bf16 %v923_v48, %v923_v48  ;;  %v922_v50 = vmul.f32 %v843_v55, %v1506_v52 }
 0x1c0   : > { %1004 = vst.msk [vmem:[%s1596_s23 + $0x4] sm:$0xf] %vm1002_vm1, %v1168_v49  ;;  %v1167_v53 = vpack.c.bf16 %v922_v50, %v922_v50 }
 0x1c2   : > { %1003 = vst.msk [vmem:[%s1596_s23] sm:$0xf] %vm1002_vm1, %v1167_v53 }
 0x1c3   : > { %v1274_v62 = vpop.f32.mrf.mxu1 }
 0x1c4   : > { %v925_v54 = vmul.f32 %v1274_v62, %v1522_v6 }
 0x1c5   : > { %v853_v56 = vpop.f32.mrf.mxu1 }
 0x1c6   : > { %v1170_v58 = vpack.c.bf16 %v925_v54, %v925_v54  ;;  %v924_v60 = vmul.f32 %v853_v56, %v1514_v59 }
 0x1c8   : > { %1006 = vst.msk [vmem:[%s1596_s23 + $0xc] sm:$0xf] %vm1002_vm1, %v1170_v58  ;;  %v1169_v61 = vpack.c.bf16 %v924_v60, %v924_v60 }
 0x1ca   : > { %1005 = vst.msk [vmem:[%s1596_s23 + $0x8] sm:$0xf] %vm1002_vm1, %v1169_v61 }
 0x1cb   : > { %v1277_v52 = vpop.f32.mrf.mxu1 }
 0x1cc   : > { %v927_v63 = vmul.f32 %v1277_v52, %v1530_v18 }
 0x1cd   : > { %v863_v0 = vpop.f32.mrf.mxu1 }
 0x1ce   : > { %v1172_v1 = vpack.c.bf16 %v927_v63, %v927_v63  ;;  %v926_v2 = vmul.f32 %v863_v0, %v1527_v13 }
 0x1d0   : > { %1008 = vst.msk [vmem:[%s1596_s23 + $0x14] sm:$0xf] %vm1002_vm1, %v1172_v1  ;;  %v1171_v6 = vpack.c.bf16 %v926_v2, %v926_v2 }
 0x1d2   : > { %1007 = vst.msk [vmem:[%s1596_s23 + $0x10] sm:$0xf] %vm1002_vm1, %v1171_v6 }
 0x1d3   : > { %v1280_v59 = vpop.f32.mrf.mxu1 }
 0x1d4   : > { %v929_v4 = vmul.f32 %v1280_v59, %v1539_v30 }
 0x1d5   : > { %v873_v5 = vpop.f32.mrf.mxu1 }
 0x1d6   : > { %v1174_v7 = vpack.c.bf16 %v929_v4, %v929_v4  ;;  %v928_v8 = vmul.f32 %v873_v5, %v1535_v26 }
 0x1d8   : > { %1010 = vst.msk [vmem:[%s1596_s23 + $0x1c] sm:$0xf] %vm1002_vm1, %v1174_v7  ;;  %v1173_v18 = vpack.c.bf16 %v928_v8, %v928_v8 }
 0x1da   : > { %1009 = vst.msk [vmem:[%s1596_s23 + $0x18] sm:$0xf] %vm1002_vm1, %v1173_v18 }
 0x1db   : > { %v1283_v13 = vpop.f32.mrf.mxu1 }
 0x1dc   : > { %v931_v9 = vmul.f32 %v1283_v13, %v1547_v43 }
 0x1dd   : > { %v883_v10 = vpop.f32.mrf.mxu1 }
 0x1de   : > { %v1176_v11 = vpack.c.bf16 %v931_v9, %v931_v9  ;;  %v930_v14 = vmul.f32 %v883_v10, %v1544_v38 }
 0x1e0   : > { %1012 = vst.msk [vmem:[%s1596_s23 + $0x24] sm:$0xf] %vm1002_vm1, %v1176_v11  ;;  %v1175_v30 = vpack.c.bf16 %v930_v14, %v930_v14 }
 0x1e2   : > { %1011 = vst.msk [vmem:[%s1596_s23 + $0x20] sm:$0xf] %vm1002_vm1, %v1175_v30 }
 0x1e3   : > { %v1286_v26 = vpop.f32.mrf.mxu1 }
 0x1e4   : > { %v933_v15 = vmul.f32 %v1286_v26, %v1556_v57 }
 0x1e5   : > { %v893_v17 = vpop.f32.mrf.mxu1 }
 0x1e6   : > { %v1178_v19 = vpack.c.bf16 %v933_v15, %v933_v15  ;;  %v932_v20 = vmul.f32 %v893_v17, %v1552_v51 }
 0x1e7   : > { %v1289_v43 = vpop.f32.mrf.mxu1 }
 0x1e8   : > { %1014 = vst.msk [vmem:[%s1596_s23 + $0x2c] sm:$0xf] %vm1002_vm1, %v1178_v19  ;;  %v1177_v21 = vpack.c.bf16 %v932_v20, %v932_v20  ;;  %v935_v38 = vmul.f32 %v1289_v43, %v1566_v12 }
 0x1e9   : > { %v903_v22 = vpop.f32.mrf.mxu1 }
 0x1ea   : > { %1013 = vst.msk [vmem:[%s1596_s23 + $0x28] sm:$0xf] %vm1002_vm1, %v1177_v21  ;;  %v1180_v23 = vpack.c.bf16 %v935_v38, %v935_v38  ;;  %v934_v24 = vmul.f32 %v903_v22, %v1561_v3 }
 0x1eb   : > { %v1292_v57 = vpop.f32.mrf.mxu1 }
 0x1ec   : > { %1016 = vst.msk [vmem:[%s1596_s23 + $0x34] sm:$0xf] %vm1002_vm1, %v1180_v23  ;;  %v1179_v25 = vpack.c.bf16 %v934_v24, %v934_v24  ;;  %v937_v51 = vmul.f32 %v1292_v57, %v1578_v34 }
 0x1ed   : > { %v913_v27 = vpop.f32.mrf.mxu1 }
 0x1ee   : > { %1015 = vst.msk [vmem:[%s1596_s23 + $0x30] sm:$0xf] %vm1002_vm1, %v1179_v25  ;;  %v1182_v28 = vpack.c.bf16 %v937_v51, %v937_v51  ;;  %v936_v29 = vmul.f32 %v913_v27, %v1570_v16 }
 0x1f0   : > { %1018 = vst.msk [vmem:[%s1596_s23 + $0x3c] sm:$0xf] %vm1002_vm1, %v1182_v28  ;;  %v1181_v12 = vpack.c.bf16 %v936_v29, %v936_v29 }
 0x1f2   : > { %1017 = vst.msk [vmem:[%s1596_s23 + $0x38] sm:$0xf] %vm1002_vm1, %v1181_v12 }
 0x1f3 PF: > { %s15_s18 = sadd.s32 1, %s1366_s18  }
 0x1f4   : > { %p12_p4 = scmp.ge.s32.totalorder %s15_s18, 4  }
 0x1f6   :  { %14 = sbr.rel (!%p12_p4) target bundleno = 1 (0x1), region = 73 }

// kernel: gcn_forward.5
= control target key start
LH: loop header
LB: loop body
LE: loop exit
PB: predicated region body
PF: predicated region fallthrough
CT: control target
= control target key end

     0   :  { %s2168_s21 = smov 0   ;;  %s2170_s22 = smov 0   ;;  %s2969_s0 = inlined_call_operand.vmem [shape: bf16[256,256], index: 0, kind: input, shape index: {}, may-alias: {0,1}]   ;;  %s2970_s1 = inlined_call_operand.vmem [shape: bf16[256,256], index: 1, kind: input, shape index: {}, may-alias: {0,1}]   ;;  %s2971_s2 = inlined_call_operand.vmem [shape: bf16[256,8], index: 2, kind: input, shape index: {}]   ;;  %s2972_s3 = inlined_call_operand.vmem [shape: f32[256,1], index: 3, kind: input, shape index: {}]   ;;  %s2973_s4 = inlined_call_operand.vmem [shape: f32[1,8], index: 4, kind: input, shape index: {}]   ;;  %s2974_s5 = inlined_call_operand.vmem [shape: f32[256,8], index: 5, kind: output, shape index: {0}]   ;;  %s2975_s6 = inlined_call_operand.vmem [shape: f32[8,256], index: 6, kind: output, shape index: {1}]  }
   0x1   :  { %s2172_s23 = smov 0  }
   0x2 LB: > { %s2184_s24 = sadd.s32 4294967295, %s2130_s23   ;;  %s2187_s25 = sadd.s32 1, %s2130_s23   ;;  %s2130_s23 = sphi %s2172_s23, %s2978_s23   ;;  %s2126_s22 = sphi %s2170_s22, %s2977_s22   ;;  %s2122_s21 = sphi %s2168_s21, %s2976_s21  }
   0x3   : > { %s47_s26 = ssub.s32 %s2130_s23, %s2187_s25  ;;  %s50_s27 = sadd.s32 1, %s2126_s22 }
   0x4   : > { %p48_p0 = scmp.eq.s32.totalorder %s47_s26, 0  ;;  %p57_p1 = scmp.ne.s32.totalorder %s2126_s22, %s2122_s21 }
   0x5   : > { %p58_p2 = scmp.eq.s32.totalorder %s2130_s23, 0  ;;  %p1659_p4 = scmp.ge.s32.totalorder %s2130_s23, 2 }
   0x6   : > { %s2196_s28 = scalar_select %p48_p0, %s2126_s22, %s50_s27  }
   0x7   : > { %p59_p3 = por %p58_p2, %p57_p1  ;;  %209 = sbr.rel (%p1659_p4) target bundleno = 37 (0x25), region = 24 }
   0xc   : > { %222 = sbr.rel (!%p59_p3) target bundleno = 37 (0x25), region = 32  ;;  %s224_s29 = sand.u32 (%p59_p3), 1, %s2126_s22  }
   0xd   : > { %s1661_s30 = sshll.u32 (%p59_p3), %s2130_s23, 2  ;;  %s1660_s7 = sshll.u32 (%p59_p3), %s224_s29, 7 }
   0xe   : > { %s2204_s10 = scalar_lea.vmem (%p59_p3), %s2970_s1, %s1661_s30  ;;  %s2208_s11 = scalar_lea.vmem (%p59_p3), [#allocation2], %s1660_s7 }
   0xf   : > { %v245_v0 = vld [vmem:[%s2204_s10] sm:$0xf] (%p59_p3)  ;;  %v247_v1 = vld [vmem:[%s2204_s10 + $0x8] sm:$0xf] (%p59_p3)  ;;  %v249_v2 = vld [vmem:[%s2204_s10 + $0x10] sm:$0xf] (%p59_p3) }
  0x10   : > { %246 = vst [vmem:[%s2208_s11] sm:$0xf] (%p59_p3), %v245_v0  ;;  %248 = vst [vmem:[%s2208_s11 + $0x4] sm:$0xf] (%p59_p3), %v247_v1  ;;  %v251_v3 = vld [vmem:[%s2204_s10 + $0x18] sm:$0xf] (%p59_p3) }
  0x11   : > { %v253_v4 = vld [vmem:[%s2204_s10 + $0x20] sm:$0xf]  ;;  %250 = vst [vmem:[%s2208_s11 + $0x8] sm:$0xf] %v249_v2  ;;  %252 = vst [vmem:[%s2208_s11 + $0xc] sm:$0xf] %v251_v3 }
  0x12   : > { %254 = vst [vmem:[%s2208_s11 + $0x10] sm:$0xf] %v253_v4  ;;  %v255_v5 = vld [vmem:[%s2204_s10 + $0x28] sm:$0xf]  ;;  %v257_v6 = vld [vmem:[%s2204_s10 + $0x30] sm:$0xf] }
  0x13   : > { %v259_v7 = vld [vmem:[%s2204_s10 + $0x38] sm:$0xf]  ;;  %256 = vst [vmem:[%s2208_s11 + $0x14] sm:$0xf] %v255_v5  ;;  %258 = vst [vmem:[%s2208_s11 + $0x18] sm:$0xf] %v257_v6 }
  0x14   : > { %260 = vst [vmem:[%s2208_s11 + $0x1c] sm:$0xf] %v259_v7  ;;  %v261_v8 = vld [vmem:[%s2204_s10 + $0x40] sm:$0xf]  ;;  %v263_v9 = vld [vmem:[%s2204_s10 + $0x48] sm:$0xf] }
  0x15   : > { %v265_v10 = vld [vmem:[%s2204_s10 + $0x50] sm:$0xf]  ;;  %262 = vst [vmem:[%s2208_s11 + $0x20] sm:$0xf] %v261_v8  ;;  %264 = vst [vmem:[%s2208_s11 + $0x24] sm:$0xf] %v263_v9 }
  0x16   : > { %266 = vst [vmem:[%s2208_s11 + $0x28] sm:$0xf] %v265_v10  ;;  %v267_v11 = vld [vmem:[%s2204_s10 + $0x58] sm:$0xf]  ;;  %v269_v12 = vld [vmem:[%s2204_s10 + $0x60] sm:$0xf] }
  0x17   : > { %v271_v13 = vld [vmem:[%s2204_s10 + $0x68] sm:$0xf]  ;;  %268 = vst [vmem:[%s2208_s11 + $0x2c] sm:$0xf] %v267_v11  ;;  %270 = vst [vmem:[%s2208_s11 + $0x30] sm:$0xf] %v269_v12 }
  0x18   : > { %272 = vst [vmem:[%s2208_s11 + $0x34] sm:$0xf] %v271_v13  ;;  %v273_v14 = vld [vmem:[%s2204_s10 + $0x70] sm:$0xf]  ;;  %v275_v15 = vld [vmem:[%s2204_s10 + $0x78] sm:$0xf] }
  0x19   : > { %v277_v16 = vld [vmem:[%s2204_s10 + $0x80] sm:$0xf]  ;;  %274 = vst [vmem:[%s2208_s11 + $0x38] sm:$0xf] %v273_v14  ;;  %276 = vst [vmem:[%s2208_s11 + $0x3c] sm:$0xf] %v275_v15 }
  0x1a   : > { %278 = vst [vmem:[%s2208_s11 + $0x40] sm:$0xf] %v277_v16  ;;  %v279_v17 = vld [vmem:[%s2204_s10 + $0x88] sm:$0xf]  ;;  %v281_v18 = vld [vmem:[%s2204_s10 + $0x90] sm:$0xf] }
  0x1b   : > { %v283_v19 = vld [vmem:[%s2204_s10 + $0x98] sm:$0xf]  ;;  %280 = vst [vmem:[%s2208_s11 + $0x44] sm:$0xf] %v279_v17  ;;  %282 = vst [vmem:[%s2208_s11 + $0x48] sm:$0xf] %v281_v18 }
  0x1c   : > { %284 = vst [vmem:[%s2208_s11 + $0x4c] sm:$0xf] %v283_v19  ;;  %v285_v20 = vld [vmem:[%s2204_s10 + $0xa0] sm:$0xf]  ;;  %v287_v21 = vld [vmem:[%s2204_s10 + $0xa8] sm:$0xf] }
  0x1d   : > { %v289_v22 = vld [vmem:[%s2204_s10 + $0xb0] sm:$0xf]  ;;  %286 = vst [vmem:[%s2208_s11 + $0x50] sm:$0xf] %v285_v20  ;;  %288 = vst [vmem:[%s2208_s11 + $0x54] sm:$0xf] %v287_v21 }
  0x1e   : > { %290 = vst [vmem:[%s2208_s11 + $0x58] sm:$0xf] %v289_v22  ;;  %v291_v23 = vld [vmem:[%s2204_s10 + $0xb8] sm:$0xf]  ;;  %v293_v24 = vld [vmem:[%s2204_s10 + $0xc0] sm:$0xf] }
  0x1f   : > { %v295_v25 = vld [vmem:[%s2204_s10 + $0xc8] sm:$0xf]  ;;  %292 = vst [vmem:[%s2208_s11 + $0x5c] sm:$0xf] %v291_v23  ;;  %294 = vst [vmem:[%s2208_s11 + $0x60] sm:$0xf] %v293_v24 }
  0x20   : > { %296 = vst [vmem:[%s2208_s11 + $0x64] sm:$0xf] %v295_v25  ;;  %v297_v26 = vld [vmem:[%s2204_s10 + $0xd0] sm:$0xf]  ;;  %v299_v27 = vld [vmem:[%s2204_s10 + $0xd8] sm:$0xf] }
  0x21   : > { %v301_v28 = vld [vmem:[%s2204_s10 + $0xe0] sm:$0xf]  ;;  %298 = vst [vmem:[%s2208_s11 + $0x68] sm:$0xf] %v297_v26  ;;  %300 = vst [vmem:[%s2208_s11 + $0x6c] sm:$0xf] %v299_v27 }
  0x22   : > { %302 = vst [vmem:[%s2208_s11 + $0x70] sm:$0xf] %v301_v28  ;;  %v303_v29 = vld [vmem:[%s2204_s10 + $0xe8] sm:$0xf]  ;;  %v305_v30 = vld [vmem:[%s2204_s10 + $0xf0] sm:$0xf] }
  0x23   : > { %v307_v31 = vld [vmem:[%s2204_s10 + $0xf8] sm:$0xf]  ;;  %304 = vst [vmem:[%s2208_s11 + $0x74] sm:$0xf] %v303_v29  ;;  %306 = vst [vmem:[%s2208_s11 + $0x78] sm:$0xf] %v305_v30 }
  0x24   : > { %308 = vst [vmem:[%s2208_s11 + $0x7c] sm:$0xf] %v307_v31 }
  0x25 PF: > { %p1662_p5 = scmp.ge.s32.totalorder %s2130_s23, 1  ;;  %p404_p6 = scmp.lt.s32.totalorder %s2130_s23, 3 }
  0x27   : > { %p405_p7 = pnand %p1662_p5, %p404_p6 }
  0x28   : > { %s1664_s14 = sshll.u32 (!%p405_p7), %s2184_s24, 4  ;;  %p474_p9 = scmp.lt.s32.totalorder (!%p405_p7), %s2184_s24, 1 }
  0x29   : > { %408 = sbr.rel (%p405_p7) target bundleno = 651 (0x28b), region = 77  ;;  %p456_p8 = scmp.lt.s32.totalorder (!%p405_p7), %s1664_s14, 31 }
  0x2e   : > { %v2011_v32 = vld [vmem:[%s2971_s2 + $0x78] sm:$0xff]   ;;  %v2013_v34 = vld [vmem:[%s2971_s2 + $0x70] sm:$0xff]   ;;  %v2015_v36 = vld [vmem:[%s2971_s2 + $0x68] sm:$0xff]   ;;  %v2132_v37 = vmov 0   ;;  %s2980_s14 = smov (!%p456_p8, %s1664_s14), 31 }
  0x2f   : > { %v2012_v33 = vld [vmem:[%s2971_s2 + $0x38] sm:$0xff]   ;;  %1788 = vmatprep.subr.bf16.mxu0 %v2011_v32  ;;  %1852 = vmatprep.subr.bf16.mxu1 %v2011_v32  ;;  %v2014_v35 = vld [vmem:[%s2971_s2 + $0x30] sm:$0xff]   ;;  %v2016_v38 = vld [vmem:[%s2971_s2 + $0x28] sm:$0xff]   ;;  %s2296_s8 = sshll.u32 %s2980_s14, 3  ;;  %s411_s14 = sand.u32 1, %s2122_s21  }
  0x30   : > { %1789 = vmatpush3.bf16.msra.mxu0 %v2012_v33  ;;  %1860 = vmatpush3.bf16.msra.mxu1 %v2012_v33  ;;  %v2017_v39 = vld [vmem:[%s2971_s2 + $0x60] sm:$0xff]   ;;  %v2019_v41 = vld [vmem:[%s2971_s2 + $0x58] sm:$0xff]   ;;  %s2308_s16 = scalar_lea.vmem %s2969_s0, %s2296_s8  ;;  %v2021_v43 = vld [vmem:[%s2971_s2 + $0x50] sm:$0xff]   ;;  %s2339_s29 = scalar_lea.vmem %s2972_s3, %s2296_s8 }
  0x31   : > { %1790 = vmatprep.subr.bf16.mxu0 %v2013_v34  ;;  %1853 = vmatprep.subr.bf16.mxu1 %v2013_v34  ;;  %v2018_v40 = vld [vmem:[%s2971_s2 + $0x20] sm:$0xff]   ;;  %v2020_v42 = vld [vmem:[%s2971_s2 + $0x18] sm:$0xff]   ;;  %v2320_v45 = vld [vmem:[%s2308_s16 + $0x8] sm:$0xff]  ;;  %s1663_s17 = sshll.u32 %s411_s14, 7  ;;  %s1705_s21 = sshll.u32 %s2184_s24, 7 }
  0x32   : > { %1897 = vset.pattern.permute.xlu0 %v2132_v37  ;;  %1898 = vset.pattern.permute.xlu1 %v2132_v37  ;;  %v2317_v44 = vld [vmem:[%s2308_s16] sm:$0xff]  ;;  %v2328_v48 = vld [vmem:[%s2308_s16 + $0x48] sm:$0xff]  ;;  %v2022_v50 = vld [vmem:[%s2971_s2 + $0x10] sm:$0xff]   ;;  %s2422_s18 = scalar_lea.vmem [#allocation2], %s1663_s17  ;;  %s2982_s24 = smov (!%p474_p9, %s2184_s24), 1 }
  0x33   : > { %v2323_v46 = vld [vmem:[%s2308_s16 + $0x40] sm:$0xff]  ;;  %v1673_v47 = vcombine.high %v2317_v44, %v2320_v45  ;;  %v2023_v51 = vld [vmem:[%s2971_s2 + $0x48] sm:$0xff]   ;;  %v481_v53 = vld [vmem:[%s2339_s29 + $0x10] sm:$0xff]  ;;  %v1672_v63 = vcombine.low %v2317_v44, %v2320_v45  ;;  %s1671_s27 = sshll.u32 %s2982_s24, 3  ;;  %s2909_s12 = scalar_lea.vmem %s2974_s5, %s2296_s8 }
  0x34   : > { %1791 = vmatpush3.bf16.msra.mxu0 %v2014_v35  ;;  %1861 = vmatpush3.bf16.msra.mxu1 %v2014_v35  ;;  %v1681_v49 = vcombine.high %v2323_v46, %v2328_v48  ;;  %v479_v52 = vld [vmem:[%s2339_s29] sm:$0xff]  ;;  %v2024_v54 = vld [vmem:[%s2971_s2 + $0x8] sm:$0xff]   ;;  %v482_v57 = vld [vmem:[%s2339_s29 + $0x18] sm:$0xff]  ;;  %v1680_v0 = vcombine.low %v2323_v46, %v2328_v48  ;;  %s477_s9 = scalar_lea.vmem %s2975_s6, %s1671_s27 }
  0x35   : > { %1792 = vmatprep.subr.bf16.mxu0 %v2015_v36  ;;  %1854 = vmatprep.subr.bf16.mxu1 %v2015_v36  ;;  %v2025_v55 = vld [vmem:[%s2971_s2 + $0x40] sm:$0xff]   ;;  %v480_v56 = vld [vmem:[%s2339_s29 + $0x8] sm:$0xff]  ;;  %v2358_v59 = vld [vmem:[%s2308_s16 + $0x10] sm:$0xff] }
  0x36   : > { %751 = vmatprep.mubr.bf16.mxu0 %v1673_v47  ;;  %783 = vmatprep.mubr.bf16.mxu1 %v1681_v49  ;;  %v2026_v58 = vld [vmem:[%s2971_s2] sm:$0xff]   ;;  %v2361_v60 = vld [vmem:[%s2308_s16 + $0x18] sm:$0xff]  ;;  %v2364_v61 = vld [vmem:[%s2308_s16 + $0x50] sm:$0xff] }
  0x37   : > { %818 = vperm.xlu0 %1897, %v479_v52   ;;  %828 = vperm.xlu1 %1898, %v481_v53   ;;  %v2367_v62 = vld [vmem:[%s2308_s16 + $0x58] sm:$0xff]  ;;  %v483_v1 = vld [vmem:[%s2339_s29 + $0x20] sm:$0xff]  ;;  %v484_v2 = vld [vmem:[%s2339_s29 + $0x28] sm:$0xff]  ;;  %v1675_v3 = vcombine.high %v2358_v59, %v2361_v60  ;;  %v1674_v11 = vcombine.low %v2358_v59, %v2361_v60 }
  0x38   : > { %1793 = vmatpush3.bf16.msra.mxu0 %v2016_v38  ;;  %1862 = vmatpush3.bf16.msra.mxu1 %v2016_v38  ;;  %v1683_v4 = vcombine.high %v2364_v61, %v2367_v62  ;;  %v485_v5 = vld [vmem:[%s2339_s29 + $0x30] sm:$0xff]  ;;  %v486_v6 = vld [vmem:[%s2339_s29 + $0x38] sm:$0xff]  ;;  %v2382_v7 = vld [vmem:[%s2308_s16 + $0x20] sm:$0xff]  ;;  %v1682_v12 = vcombine.low %v2364_v61, %v2367_v62 }
  0x39   : > { %1794 = vmatprep.subr.bf16.mxu0 %v2017_v39  ;;  %1855 = vmatprep.subr.bf16.mxu1 %v2017_v39  ;;  %v2385_v8 = vld [vmem:[%s2308_s16 + $0x28] sm:$0xff]  ;;  %v2388_v9 = vld [vmem:[%s2308_s16 + $0x60] sm:$0xff]  ;;  %v489_v17 = vld [vmem:[%s2339_s29 + $0x50] sm:$0xff] }
  0x3a   : > { %v508_v10 = vld [vmem:[%s2308_s16 + $0x68] sm:$0xff]  ;;  %v487_v13 = vld [vmem:[%s2339_s29 + $0x40] sm:$0xff]  ;;  %v1677_v15 = vcombine.high %v2382_v7, %v2385_v8  ;;  %v490_v18 = vld [vmem:[%s2339_s29 + $0x58] sm:$0xff]  ;;  %v1676_v21 = vcombine.low %v2382_v7, %v2385_v8 }
  0x3b   : > { %823 = vperm.xlu0 %1897, %v480_v56   ;;  %833 = vperm.xlu1 %1898, %v482_v57   ;;  %v488_v14 = vld [vmem:[%s2339_s29 + $0x48] sm:$0xff]  ;;  %v1685_v16 = vcombine.high %v2388_v9, %v508_v10  ;;  %v2403_v19 = vld [vmem:[%s2308_s16 + $0x30] sm:$0xff]  ;;  %v2406_v20 = vld [vmem:[%s2308_s16 + $0x38] sm:$0xff]  ;;  %v1684_v22 = vcombine.low %v2388_v9, %v508_v10 }
  0x3c   : > { %1795 = vmatpush3.bf16.msra.mxu0 %v2018_v40  ;;  %1863 = vmatpush3.bf16.msra.mxu1 %v2018_v40  ;;  %v491_v23 = vld [vmem:[%s2339_s29 + $0x60] sm:$0xff]  ;;  %v492_v24 = vld [vmem:[%s2339_s29 + $0x68] sm:$0xff]  ;;  %v1679_v25 = vcombine.high %v2403_v19, %v2406_v20  ;;  %v2040_v26 = vld [vmem:[%s2308_s16 + $0x74] ss:$8 sps:$4 sm:$0xff]   ;;  %v1678_v29 = vcombine.low %v2403_v19, %v2406_v20 }
  0x3d   : > { %1796 = vmatprep.subr.bf16.mxu0 %v2019_v41  ;;  %1856 = vmatprep.subr.bf16.mxu1 %v2019_v41  ;;  %v493_v27 = vld [vmem:[%s2339_s29 + $0x70] sm:$0xff]  ;;  %v494_v28 = vld [vmem:[%s2339_s29 + $0x78] sm:$0xff]  ;;  %v1710_v31 = vld [vmem:[%s2422_s18] sm:$0xff]  }
  0x3e   : > { %v2043_v30 = vld [vmem:[%s2308_s16 + $0x70] ss:$8 sps:$4 sm:$0xff]   ;;  %v1780_v32 = vld [vmem:[%s2422_s18 + $0x40] sm:$0xff]   ;;  %v1711_v33 = vunpack.c.l.bf16 %v1710_v31  ;;  %v1712_v35 = vunpack.c.h.bf16 %v1710_v31  ;;  %v1773_v38 = vld [vmem:[%s2422_s18 + $0x8] sm:$0xff]  }
  0x3f   : > { %838 = vperm.xlu0 %1897, %v483_v1   ;;  %843 = vperm.xlu1 %1898, %v484_v2   ;;  %v1743_v34 = vunpack.c.l.bf16 %v1780_v32  ;;  %v1744_v36 = vunpack.c.h.bf16 %v1780_v32  ;;  %v1781_v39 = vld [vmem:[%s2422_s18 + $0x48] sm:$0xff]   ;;  %v1715_v41 = vunpack.c.l.bf16 %v1773_v38  ;;  %v1716_v47 = vunpack.c.h.bf16 %v1773_v38  ;;  %v1784_v10 = vld [vmem:[%s2422_s18 + $0x60] sm:$0xff]  }
  0x40   : > { %1797 = vmatpush3.bf16.msra.mxu0 %v2020_v42  ;;  %1864 = vmatpush3.bf16.msra.mxu1 %v2020_v42  ;;  %v1747_v42 = vunpack.c.l.bf16 %v1781_v39  ;;  %v1748_v49 = vunpack.c.h.bf16 %v1781_v39 }
  0x41   : > { %1798 = vmatprep.subr.bf16.mxu0 %v2021_v43  ;;  %1857 = vmatprep.subr.bf16.mxu1 %v2021_v43  ;;  %v1899_v37 = vpack.i.bf16 %v1743_v34, %v1711_v33  ;;  %v1901_v40 = vpack.i.bf16 %v1744_v36, %v1712_v35  ;;  %v1779_v35 = vld [vmem:[%s2422_s18 + $0x38] sm:$0xff]  }
  0x42   : > { %v1903_v43 = vpack.i.bf16 %v1747_v42, %v1715_v41  ;;  %v1905_v52 = vpack.i.bf16 %v1748_v49, %v1716_v47  ;;  %v1787_v36 = vld [vmem:[%s2422_s18 + $0x78] sm:$0xff]   ;;  %v1739_v38 = vunpack.c.l.bf16 %v1779_v35  ;;  %v1740_v41 = vunpack.c.h.bf16 %v1779_v35 }
  0x43   : > { %848 = vperm.xlu0 %1897, %v485_v5   ;;  %853 = vperm.xlu1 %1898, %v486_v6   ;;  %v1776_v6 = vld [vmem:[%s2422_s18 + $0x20] sm:$0xff]   ;;  %v1771_v39 = vunpack.c.l.bf16 %v1787_v36  ;;  %v1772_v42 = vunpack.c.h.bf16 %v1787_v36  ;;  %v1393_v49 = vlaneseq  ;;  %v1168_v36 = vunpack.c.l.bf16 %v2382_v7 }
  0x44   : > { %1799 = vmatpush3.bf16.msra.mxu0 %v2022_v50  ;;  %1865 = vmatpush3.bf16.msra.mxu1 %v2022_v50  ;;  %v1774_v50 = vld [vmem:[%s2422_s18 + $0x10] sm:$0xff]  }
  0x45   : > { %1800 = vmatprep.subr.bf16.mxu0 %v2023_v51  ;;  %1858 = vmatprep.subr.bf16.mxu1 %v2023_v51  ;;  %v1782_v51 = vld [vmem:[%s2422_s18 + $0x50] sm:$0xff]   ;;  %v1719_v53 = vunpack.c.l.bf16 %v1774_v50  ;;  %v1720_v56 = vunpack.c.h.bf16 %v1774_v50  ;;  %v2443_v50 = vstv %s1705_s21 }
  0x46   : > { %v1752_v57 = vunpack.c.h.bf16 %v1782_v51 }
  0x47   : > { %858 = vperm.xlu0 %1897, %v487_v13   ;;  %863 = vperm.xlu1 %1898, %v488_v14   ;;  %v1759_v13 = vunpack.c.l.bf16 %v1784_v10 }
  0x48   : > { %1801 = vmatpush3.bf16.msra.mxu0 %v2024_v54  ;;  %1866 = vmatpush3.bf16.msra.mxu1 %v2024_v54  ;;  %v1751_v54 = vunpack.c.l.bf16 %v1782_v51  ;;  %v2445_v51 = vshrl.u32 %v1393_v49, 7 }
  0x49   : > { %1802 = vmatprep.subr.bf16.mxu0 %v2025_v55  ;;  %1859 = vmatprep.subr.bf16.mxu1 %v2025_v55 }
  0x4a   : > { %v1907_v55 = vpack.i.bf16 %v1751_v54, %v1719_v53  ;;  %v1411_v54 = vadd.s32 %v2443_v50, %v2445_v51  ;;  %v1399_v35 = vadd.s32 40, %v2445_v51 }
  0x4b   : > { %868 = vperm.xlu0 %1897, %v489_v17   ;;  %873 = vperm.xlu1 %1898, %v490_v18   ;;  %v1777_v17 = vld [vmem:[%s2422_s18 + $0x28] sm:$0xff]  }
  0x4c   : > { %1803 = vmatpush3.bf16.msra.mxu0 %v2026_v58  ;;  %1867 = vmatpush3.bf16.msra.mxu1 %v2026_v58  ;;  %v1775_v58 = vld [vmem:[%s2422_s18 + $0x18] sm:$0xff]   ;;  %v1785_v18 = vld [vmem:[%s2422_s18 + $0x68] sm:$0xff]  }
  0x4d   : > { %v1723_v1 = vunpack.c.l.bf16 %v1775_v58 }
  0x4f   : > { %752 = vmatmul.mubr.bf16.vlgmr.msra.gmra.mxu0 %v1672_v63  ;;  %784 = vmatmul.mubr.bf16.vlgmr.msra.gmra.mxu1 %v1680_v0  ;;  %v1783_v63 = vld [vmem:[%s2422_s18 + $0x58] sm:$0xff]   ;;  %v1909_v0 = vpack.i.bf16 %v1752_v57, %v1720_v56  ;;  %v1395_v56 = vadd.s32 8, %v2445_v51  ;;  %v1160_v57 = vunpack.c.l.bf16 %v2317_v44 }
  0x50   : > { %759 = vmatprep.mubr.bf16.mxu0 %v1675_v3  ;;  %791 = vmatprep.mubr.bf16.mxu1 %v1683_v4  ;;  %v1755_v2 = vunpack.c.l.bf16 %v1783_v63  ;;  %v1724_v4 = vunpack.c.h.bf16 %v1775_v58  ;;  %v1756_v5 = vunpack.c.h.bf16 %v1783_v63  ;;  %v1161_v58 = vunpack.c.h.bf16 %v2317_v44 }
  0x51   : > { %878 = vperm.xlu0 %1897, %v491_v23   ;;  %883 = vperm.xlu1 %1898, %v492_v24   ;;  %v1763_v23 = vunpack.c.l.bf16 %v1785_v18  ;;  %v1412_v63 = vadd.s32 %v2443_v50, %v1395_v56  ;;  %v1170_v56 = vunpack.c.l.bf16 %v2385_v8 }
  0x52   : > { %v1911_v3 = vpack.i.bf16 %v1755_v2, %v1723_v1  ;;  %v1396_v2 = vadd.s32 16, %v2445_v51 }
  0x55   : > { %888 = vperm.xlu0 %1897, %v493_v27   ;;  %893 = vperm.xlu1 %1898, %v494_v28   ;;  %v1778_v27 = vld [vmem:[%s2422_s18 + $0x30] sm:$0xff]  }
  0x56   : > { %v1786_v28 = vld [vmem:[%s2422_s18 + $0x70] sm:$0xff]   ;;  %v1736_v33 = vunpack.c.h.bf16 %v1778_v27 }
  0x57   : > { %760 = vmatmul.mubr.bf16.gmra.mxu0 %v1674_v11  ;;  %792 = vmatmul.mubr.bf16.gmra.mxu1 %v1682_v12  ;;  %v1913_v11 = vpack.i.bf16 %v1756_v5, %v1724_v4  ;;  %v1727_v12 = vunpack.c.l.bf16 %v1776_v6  ;;  %v1767_v31 = vunpack.c.l.bf16 %v1786_v28  ;;  %v1768_v34 = vunpack.c.h.bf16 %v1786_v28 }
  0x58   : > { %767 = vmatprep.mubr.bf16.mxu0 %v1677_v15  ;;  %799 = vmatprep.mubr.bf16.mxu1 %v1685_v16  ;;  %v1728_v15 = vunpack.c.h.bf16 %v1776_v6  ;;  %v1760_v16 = vunpack.c.h.bf16 %v1784_v10  ;;  %v1413_v10 = vadd.s32 %v2443_v50, %v1396_v2  ;;  %v1171_v2 = vunpack.c.h.bf16 %v2385_v8 }
  0x59   : > { %v1915_v14 = vpack.i.bf16 %v1759_v13, %v1727_v12 }
  0x5f   : > { %768 = vmatmul.mubr.bf16.gmra.mxu0 %v1676_v21  ;;  %800 = vmatmul.mubr.bf16.gmra.mxu1 %v1684_v22  ;;  %v1917_v21 = vpack.i.bf16 %v1760_v16, %v1728_v15  ;;  %v1731_v22 = vunpack.c.l.bf16 %v1777_v17  ;;  %v1397_v15 = vadd.s32 24, %v2445_v51  ;;  %v1164_v16 = vunpack.c.l.bf16 %v2358_v59 }
  0x60   : > { %775 = vmatprep.mubr.bf16.mxu0 %v1679_v25  ;;  %807 = vmatprep.mubr.bf16.mxu1 %v2040_v26  ;;  %v1732_v25 = vunpack.c.h.bf16 %v1777_v17  ;;  %v1764_v26 = vunpack.c.h.bf16 %v1785_v18 }
  0x61   : > { %v1919_v24 = vpack.i.bf16 %v1763_v23, %v1731_v22  ;;  %v1165_v22 = vunpack.c.h.bf16 %v2358_v59 }
  0x67   : > { %776 = vmatmul.mubr.bf16.gmra.mxu0 %v1678_v29  ;;  %808 = vmatmul.mubr.bf16.gmra.mxu1 %v2043_v30  ;;  %v1921_v29 = vpack.i.bf16 %v1764_v26, %v1732_v25  ;;  %v1735_v30 = vunpack.c.l.bf16 %v1778_v27  ;;  %v1398_v26 = vadd.s32 32, %v2445_v51  ;;  %v1166_v27 = vunpack.c.l.bf16 %v2361_v60 }
  0x69   : > { %v1923_v32 = vpack.i.bf16 %v1767_v31, %v1735_v30  ;;  %v1415_v31 = vadd.s32 %v2443_v50, %v1398_v26 }
  0x73   : > { %1900 = vxpose.xlu0.b32.start [1/16] %v1899_v37, 128  ;;  %v1925_v37 = vpack.i.bf16 %v1768_v34, %v1736_v33 }
  0x77   : > { %1902 = vxpose.xlu0.b32.cont [2/16] %v1901_v40, 128  ;;  %v1927_v40 = vpack.i.bf16 %v1771_v39, %v1739_v38 }
  0x7b   : > { %1904 = vxpose.xlu0.b32.cont [3/16] %v1903_v43, 128  ;;  %v1929_v43 = vpack.i.bf16 %v1772_v42, %v1740_v41  ;;  %v1169_v41 = vunpack.c.h.bf16 %v2382_v7  ;;  %v2592_v7 = vld [vmem:[%s2973_s4] ss:$0 sm:$0xff] }
  0x7f   : > { %1906 = vxpose.xlu0.b32.cont [4/16] %v1905_v52, 128  ;;  %v2447_v52 = vand.u32 127, %v1393_v49 }
  0x81   : > { %vm1430_vm0 = vcmp.eq.s32.totalorder %v1411_v54, %v2447_v52  ;;  %vm1432_vm2 = vcmp.eq.s32.totalorder %v1412_v63, %v2447_v52  ;;  %vm1434_vm4 = vcmp.eq.s32.totalorder %v1413_v10, %v2447_v52  ;;  %vm1438_vm8 = vcmp.eq.s32.totalorder %v1415_v31, %v2447_v52 }
  0x82   : > { %v1466_v18 = vsel %vm1434_vm4, %v1164_v16, 0.0  ;;  %v1470_v39 = vsel %vm1438_vm8, %v1168_v36, 0.0 }
  0x83   : > { %1908 = vxpose.xlu0.b32.cont [5/16] %v1907_v55, 128  ;;  %v2454_v55 = vadd.s32 128, %v2447_v52 }
  0x85   : > { %vm1431_vm1 = vcmp.eq.s32.totalorder %v1411_v54, %v2454_v55  ;;  %vm1433_vm3 = vcmp.eq.s32.totalorder %v1412_v63, %v2454_v55  ;;  %vm1435_vm5 = vcmp.eq.s32.totalorder %v1413_v10, %v2454_v55  ;;  %vm1439_vm9 = vcmp.eq.s32.totalorder %v1415_v31, %v2454_v55 }
  0x86   : > { %v1463_v1 = vsel %vm1431_vm1, %v1161_v58, 0.0  ;;  %v1467_v25 = vsel %vm1435_vm5, %v1165_v22, 0.0  ;;  %v1400_v54 = vadd.s32 48, %v2445_v51  ;;  %vm935_vm1 = vcmask 64512  }
  0x87   : > { %1910 = vxpose.xlu0.b32.cont [6/16] %v1909_v0, 128  ;;  %v1462_v0 = vsel %vm1430_vm0, %v1160_v57, 0.0 }
  0x88   : > { %v1494_v5 = vadd.f32 %v1463_v1, %v1462_v0 }
  0x8b   : > { %1912 = vxpose.xlu0.b32.cont [7/16] %v1911_v3, 128  ;;  %v1162_v3 = vunpack.c.l.bf16 %v2320_v45 }
  0x8d   : > { %v1464_v6 = vsel %vm1432_vm2, %v1162_v3, 0.0 }
  0x8e   : > { %v1495_v12 = vadd.f32 %v1494_v5, %v1464_v6  ;;  %v1417_v5 = vadd.s32 %v2443_v50, %v1400_v54  ;;  %v1174_v54 = vunpack.c.l.bf16 %v2406_v20 }
  0x8f   : > { %1914 = vxpose.xlu0.b32.cont [8/16] %v1913_v11, 128  ;;  %v1163_v11 = vunpack.c.h.bf16 %v2320_v45  ;;  %v1175_v45 = vunpack.c.h.bf16 %v2406_v20 }
  0x90   : > { %vm1442_vm12 = vcmp.eq.s32.totalorder %v1417_v5, %v2447_v52  ;;  %vm1443_vm13 = vcmp.eq.s32.totalorder %v1417_v5, %v2454_v55 }
  0x91   : > { %v1465_v13 = vsel %vm1433_vm3, %v1163_v11, 0.0 }
  0x92   : > { %v1496_v17 = vadd.f32 %v1495_v12, %v1465_v13 }
  0x93   : > { %1916 = vxpose.xlu0.b32.cont [9/16] %v1915_v14, 128 }
  0x97   : > { %1918 = vxpose.xlu0.b32.cont [10/16] %v1917_v21, 128  ;;  %v1414_v21 = vadd.s32 %v2443_v50, %v1397_v15 }
  0x99   : > { %vm1436_vm6 = vcmp.eq.s32.totalorder %v1414_v21, %v2447_v52  ;;  %vm1437_vm7 = vcmp.eq.s32.totalorder %v1414_v21, %v2454_v55 }
  0x9b   : > { %1920 = vxpose.xlu0.b32.cont [11/16] %v1919_v24, 128  ;;  %v1497_v24 = vadd.f32 %v1496_v17, %v1466_v18  ;;  %v1401_v18 = vadd.s32 56, %v2445_v51 }
  0x9d   : > { %v1498_v28 = vadd.f32 %v1497_v24, %v1467_v25  ;;  %v1172_v25 = vunpack.c.l.bf16 %v2403_v19 }
  0x9f   : > { %1922 = vxpose.xlu0.b32.cont [12/16] %v1921_v29, 128  ;;  %v1468_v29 = vsel %vm1436_vm6, %v1166_v27, 0.0  ;;  %v1474_v44 = vsel %vm1442_vm12, %v1172_v25, 0.0 }
  0xa0   : > { %v1499_v33 = vadd.f32 %v1498_v28, %v1468_v29 }
  0xa3   : > { %1924 = vxpose.xlu0.b32.cont [13/16] %v1923_v32, 128  ;;  %v1167_v32 = vunpack.c.h.bf16 %v2361_v60 }
  0xa5   : > { %v1469_v34 = vsel %vm1437_vm7, %v1167_v32, 0.0 }
  0xa6   : > { %v1500_v38 = vadd.f32 %v1499_v33, %v1469_v34 }
  0xa7   : > { %1926 = vxpose.xlu0.b32.cont [14/16] %v1925_v37, 128 }
  0xa8   : > { %v1501_v42 = vadd.f32 %v1500_v38, %v1470_v39  ;;  %v1402_v38 = vadd.s32 64, %v2445_v51 }
  0xab   : > { %1928 = vxpose.xlu0.b32.cont [15/16] %v1927_v40, 128  ;;  %v1416_v40 = vadd.s32 %v2443_v50, %v1399_v35 }
  0xad   : > { %vm1440_vm10 = vcmp.eq.s32.totalorder %v1416_v40, %v2447_v52  ;;  %vm1441_vm11 = vcmp.eq.s32.totalorder %v1416_v40, %v2454_v55 }
  0xae   : > { %v1472_v0 = vsel %vm1440_vm10, %v1170_v56, 0.0  ;;  %v1473_v17 = vsel %vm1441_vm11, %v1171_v2, 0.0 }
  0xaf   : > { %1930 = vxpose.xlu0.b32.end [16/16] %v1929_v43, 128  ;;  %v1471_v43 = vsel %vm1439_vm9, %v1169_v41, 0.0 }
  0xb0   : > { %v1502_v63 = vadd.f32 %v1501_v42, %v1471_v43 }
  0xb2   : > { %v2440_v47 = vpop.permute.xlu0 %818  ;;  %v1503_v12 = vadd.f32 %v1502_v63, %v1472_v0  ;;  %v2535_v26 = vpop.permute.xlu1 %828 }
  0xb4   : > { %v1504_v31 = vadd.f32 %v1503_v12, %v1473_v17  ;;  %v1177_v17 = vunpack.c.h.bf16 %v2323_v46 }
  0xb6   : > { %v2449_v53 = vpop.permute.xlu0 %823  ;;  %v1505_v43 = vadd.f32 %v1504_v31, %v1474_v44  ;;  %v2554_v0 = vpop.permute.xlu1 %833  ;;  %v1179_v31 = vunpack.c.h.bf16 %v2328_v48 }
  0xba   : > { %v2469_v4 = vpop.permute.xlu0 %838 }
  0xbe   : > { %v2478_v14 = vpop.permute.xlu0 %848 }
  0xc2   : > { %v2488_v23 = vpop.permute.xlu0 %858 }
  0xc6   : > { %v2497_v30 = vpop.permute.xlu0 %868 }
  0xcc   : > { %v2507_v37 = vpop.permute.xlu0 %878 }
  0xd0   : > { %v2516_v49 = vpop.permute.xlu0 %888 }
  0xef   : > { %v1931_v1 = vpop.trf.xlu0 }
  0xf0   : > { %v1935_v6 = vunpack.i.h.bf16 %v1931_v1  ;;  %v1932_v10 = vunpack.i.l.bf16 %v1931_v1 }
  0xf2   : > { %v1321_v13 = vmul.f32 %v1935_v6, %v1161_v58  ;;  %v1320_v15 = vmul.f32 %v1932_v10, %v1160_v57  ;;  %v1173_v58 = vunpack.c.h.bf16 %v2403_v19  ;;  %v1418_v57 = vadd.s32 %v2443_v50, %v1401_v18 }
  0xf3   : > { %v1936_v21 = vpop.trf.xlu0  ;;  %v1419_v10 = vadd.s32 %v2443_v50, %v1402_v38  ;;  %v1178_v18 = vunpack.c.l.bf16 %v2328_v48  ;;  %v1180_v38 = vunpack.c.l.bf16 %v2364_v61  ;;  %v1183_v19 = vunpack.c.h.bf16 %v2367_v62 }
  0xf4   : > { %v1940_v24 = vunpack.i.h.bf16 %v1936_v21  ;;  %v1352_v28 = vadd.f32 %v1321_v13, %v1320_v15  ;;  %v1937_v29 = vunpack.i.l.bf16 %v1936_v21  ;;  %vm1444_vm14 = vcmp.eq.s32.totalorder %v1418_v57, %v2447_v52 }
  0xf5   : > { %vm1445_vm15 = vcmp.eq.s32.totalorder %v1418_v57, %v2454_v55  ;;  %v1476_v59 = vsel %vm1444_vm14, %v1174_v54, 0.0  ;;  %vm1446_vm0 = vcmp.eq.s32.totalorder %v1419_v10, %v2447_v52  ;;  %vm1447_vm2 = vcmp.eq.s32.totalorder %v1419_v10, %v2454_v55 }
  0xf6   : > { %v1323_v33 = vmul.f32 %v1940_v24, %v1163_v11  ;;  %v1322_v34 = vmul.f32 %v1937_v29, %v1162_v3  ;;  %v1475_v11 = vsel %vm1443_vm13, %v1173_v58, 0.0  ;;  %v1176_v3 = vunpack.c.l.bf16 %v2323_v46 }
  0xf7   : > { %v1941_v35 = vpop.trf.xlu0  ;;  %v1506_v15 = vadd.f32 %v1505_v43, %v1475_v11 }
  0xf8   : > { %v1945_v39 = vunpack.i.h.bf16 %v1941_v35  ;;  %v1942_v40 = vunpack.i.l.bf16 %v1941_v35  ;;  %v1353_v42 = vadd.f32 %v1352_v28, %v1322_v34  ;;  %v1477_v34 = vsel %vm1445_vm15, %v1175_v45, 0.0 }
  0xf9   : > { %v1507_v35 = vadd.f32 %v1506_v15, %v1476_v59 }
  0xfa   : > { %v1324_v63 = vmul.f32 %v1942_v40, %v1164_v16  ;;  %v1354_v1 = vadd.f32 %v1353_v42, %v1323_v33  ;;  %v1325_v5 = vmul.f32 %v1945_v39, %v1165_v22  ;;  %v1403_v22 = vadd.s32 72, %v2445_v51 }
  0xfb   : > { %v1946_v6 = vpop.trf.xlu0  ;;  %v1181_v42 = vunpack.c.h.bf16 %v2364_v61  ;;  %v1508_v59 = vadd.f32 %v1507_v35, %v1477_v34 }
  0xfc   : > { %v1950_v12 = vunpack.i.h.bf16 %v1946_v6  ;;  %v1947_v16 = vunpack.i.l.bf16 %v1946_v6  ;;  %v1355_v13 = vadd.f32 %v1354_v1, %v1324_v63  ;;  %v1420_v40 = vadd.s32 %v2443_v50, %v1403_v22 }
  0xfd   : > { %v1478_v1 = vsel %vm1446_vm0, %v1176_v3, 0.0 }
  0xfe   : > { %v1326_v21 = vmul.f32 %v1947_v16, %v1166_v27  ;;  %v1356_v24 = vadd.f32 %v1355_v13, %v1325_v5  ;;  %v1327_v28 = vmul.f32 %v1950_v12, %v1167_v32  ;;  %v2572_v27 = vpop.permute.xlu1 %843  ;;  %v1404_v5 = vadd.s32 80, %v2445_v51 }
  0xff   : > { %v1951_v29 = vpop.trf.xlu0  ;;  %vm1448_vm3 = vcmp.eq.s32.totalorder %v1420_v40, %v2447_v52  ;;  %vm1449_vm4 = vcmp.eq.s32.totalorder %v1420_v40, %v2454_v55 }
 0x100   : > { %v1955_v44 = vunpack.i.h.bf16 %v1951_v29  ;;  %v1952_v33 = vunpack.i.l.bf16 %v1951_v29  ;;  %v1357_v57 = vadd.f32 %v1356_v24, %v1326_v21  ;;  %v1182_v29 = vunpack.c.l.bf16 %v2367_v62 }
 0x102   : > { %v1328_v32 = vmul.f32 %v1952_v33, %v1168_v36  ;;  %v1358_v43 = vadd.f32 %v1357_v57, %v1327_v28  ;;  %v1329_v63 = vmul.f32 %v1955_v44, %v1169_v41  ;;  %v1479_v28 = vsel %vm1447_vm2, %v1177_v17, 0.0  ;;  %v2602_v44 = vpop.permute.xlu1 %853 }
 0x103   : > { %v1956_v11 = vpop.trf.xlu0 }
 0x104   : > { %v1960_v12 = vunpack.i.h.bf16 %v1956_v11  ;;  %v1957_v16 = vunpack.i.l.bf16 %v1956_v11  ;;  %v1359_v21 = vadd.f32 %v1358_v43, %v1328_v32 }
 0x106   : > { %v1330_v41 = vmul.f32 %v1957_v16, %v1170_v56  ;;  %v1360_v34 = vadd.f32 %v1359_v21, %v1329_v63  ;;  %v1331_v35 = vmul.f32 %v1960_v12, %v1171_v2  ;;  %v1421_v2 = vadd.s32 %v2443_v50, %v1404_v5 }
 0x107   : > { %v1961_v56 = vpop.trf.xlu0  ;;  %v1481_v5 = vsel %vm1449_vm4, %v1179_v31, 0.0 }
 0x108   : > { %v1965_v32 = vunpack.i.h.bf16 %v1961_v56  ;;  %v1962_v10 = vunpack.i.l.bf16 %v1961_v56  ;;  %v1405_v56 = vadd.s32 88, %v2445_v51  ;;  %vm1450_vm5 = vcmp.eq.s32.totalorder %v1421_v2, %v2447_v52 }
 0x109   : > { %vm1451_vm6 = vcmp.eq.s32.totalorder %v1421_v2, %v2454_v55 }
 0x10a   : > { %v1332_v8 = vmul.f32 %v1962_v10, %v1172_v25  ;;  %v864_v25 = vpop.permute.xlu1 %863 }
 0x10f   : > { %v1804_v39 = vpop.f32.mrf.mxu0  ;;  %v1828_v60 = vpop.f32.mrf.mxu1 }
 0x111   : > { %v1805_v6 = vpop.f32.mrf.mxu0  ;;  %v1829_v36 = vpop.f32.mrf.mxu1 }
 0x112   : > { %v1806_v13 = vadd.f32 %v1805_v6, %v1804_v39  ;;  %v1830_v15 = vadd.f32 %v1829_v36, %v1828_v60  ;;  %v1509_v6 = vadd.f32 %v1508_v59, %v1478_v1  ;;  %v1333_v1 = vmul.f32 %v1965_v32, %v1173_v58 }
 0x113   : > { %v1807_v22 = vpop.f32.mrf.mxu0  ;;  %v1831_v24 = vpop.f32.mrf.mxu1 }
 0x114   : > { %v896_v33 = vmul.f32 %v1806_v13, %v2440_v47  ;;  %v904_v57 = vmul.f32 %v1830_v15, %v2488_v23  ;;  %v1361_v23 = vadd.f32 %v1360_v34, %v1330_v41  ;;  %v1966_v15 = vpop.trf.xlu0  ;;  %v1510_v41 = vadd.f32 %v1509_v6, %v1479_v28 }
 0x115   : > { %v1808_v39 = vpop.f32.mrf.mxu0  ;;  %v1832_v60 = vpop.f32.mrf.mxu1 }
 0x116   : > { %v1809_v43 = vadd.f32 %v1808_v39, %v1807_v22  ;;  %v2609_v11 = vadd.f32 %v2592_v7, %v896_v33  ;;  %v1833_v36 = vadd.f32 %v1832_v60, %v1831_v24  ;;  %v2619_v13 = vadd.f32 %v2592_v7, %v904_v57 }
 0x117   : > { %v1810_v47 = vpop.f32.mrf.mxu0  ;;  %v1834_v16 = vpop.f32.mrf.mxu1  ;;  %v1362_v22 = vadd.f32 %v1361_v23, %v1331_v35  ;;  %v1970_v24 = vunpack.i.h.bf16 %v1966_v15  ;;  %v1967_v35 = vunpack.i.l.bf16 %v1966_v15 }
 0x118   : > { %v897_v63 = vmul.f32 %v1809_v43, %v2449_v53  ;;  %v936_v12 = vsel %vm935_vm1, %v2609_v11, -inf  ;;  %v1480_v53 = vsel %vm1448_vm3, %v1178_v18, 0.0  ;;  %v905_v58 = vmul.f32 %v1833_v36, %v864_v25  ;;  %v1971_v32 = vpop.trf.xlu0 }
 0x119   : > { %v1811_v21 = vpop.f32.mrf.mxu0  ;;  %v1835_v59 = vpop.f32.mrf.mxu1  ;;  %937 = vmax.xlane.f32.xlu1 %v936_v12  ;;  %v1363_v34 = vadd.f32 %v1362_v22, %v1332_v8  ;;  %v960_v39 = vsel %vm935_vm1, %v2619_v13, -inf  ;;  %v1335_v40 = vmul.f32 %v1970_v24, %v1175_v45  ;;  %v1334_v36 = vmul.f32 %v1967_v35, %v1174_v54 }
 0x11a   : > { %v1812_v28 = vadd.f32 %v1811_v21, %v1810_v47  ;;  %v2636_v60 = vadd.f32 %v2592_v7, %v897_v63  ;;  %v1975_v23 = vunpack.i.h.bf16 %v1971_v32  ;;  %v1511_v8 = vadd.f32 %v1510_v41, %v1480_v53 }
 0x11b   : > { %v1813_v33 = vpop.f32.mrf.mxu0  ;;  %v1837_v57 = vpop.f32.mrf.mxu1  ;;  %v1364_v6 = vadd.f32 %v1363_v34, %v1333_v1  ;;  %v1184_v47 = vunpack.c.l.bf16 %v2388_v9  ;;  %v1836_v63 = vadd.f32 %v1835_v59, %v1834_v16  ;;  %v1972_v15 = vunpack.i.l.bf16 %v1971_v32 }
 0x11c   : > { %v898_v21 = vmul.f32 %v1812_v28, %v2535_v26  ;;  %v939_v1 = vsel %vm935_vm1, %v2636_v60, -inf  ;;  %v2651_v20 = vadd.f32 %v2592_v7, %v905_v58  ;;  %v1337_v54 = vmul.f32 %v1975_v23, %v1177_v17  ;;  %v1976_v22 = vpop.trf.xlu0  ;;  %v874_v26 = vpop.permute.xlu1 %873 }
 0x11d   : > { %v1814_v10 = vpop.f32.mrf.mxu0  ;;  %v1838_v43 = vpop.f32.mrf.mxu1  ;;  %961 = vmax.xlane.f32.xlu1 %v960_v39  ;;  %v1365_v45 = vadd.f32 %v1364_v6, %v1334_v36  ;;  %v1336_v59 = vmul.f32 %v1972_v15, %v1176_v3  ;;  %v1980_v41 = vunpack.i.h.bf16 %v1976_v22  ;;  %v1512_v53 = vadd.f32 %v1511_v8, %v1481_v5 }
 0x11e   : > { %v1482_v58 = vsel %vm1450_vm5, %v1180_v38, 0.0  ;;  %v1483_v17 = vsel %vm1451_vm6, %v1181_v42, 0.0  ;;  %v1422_v34 = vadd.s32 %v2443_v50, %v1405_v56  ;;  %v906_v35 = vmul.f32 %v1836_v63, %v2497_v30 }
 0x11f   : > { %v2645_v12 = vpop.f32.mrf.mxu1  ;;  %v1816_v24 = vpop.f32.mrf.mxu0  ;;  %v1366_v16 = vadd.f32 %v1365_v45, %v1335_v40  ;;  %v1977_v3 = vunpack.i.l.bf16 %v1976_v22  ;;  %v1815_v39 = vadd.f32 %v1814_v10, %v1813_v33  ;;  %v963_v5 = vsel %vm935_vm1, %v2651_v20, -inf }
 0x120   : > { %v2674_v40 = vadd.f32 %v2592_v7, %v898_v21  ;;  %v1339_v32 = vmul.f32 %v1980_v41, %v1179_v31  ;;  %v1981_v2 = vpop.trf.xlu0  ;;  %v1513_v33 = vadd.f32 %v1512_v53, %v1482_v58  ;;  %vm1452_vm7 = vcmp.eq.s32.totalorder %v1422_v34, %v2447_v52  ;;  %v2687_v15 = vpop.permute.xlu1 %883 }
 0x121   : > { %v2655_v25 = vpop.f32.mrf.mxu1  ;;  %940 = vmax.xlane.f32.xlu1 %v939_v1  ;;  %v1367_v46 = vadd.f32 %v1366_v16, %v1336_v59  ;;  %v1817_v6 = vpop.f32.mrf.mxu0  ;;  %v1338_v56 = vmul.f32 %v1977_v3, %v1178_v18  ;;  %v1985_v23 = vunpack.i.h.bf16 %v1981_v2  ;;  %vm1453_vm8 = vcmp.eq.s32.totalorder %v1422_v34, %v2454_v55 }
 0x122   : > { %v1406_v10 = vadd.s32 96, %v2445_v51  ;;  %v1839_v8 = vadd.f32 %v1838_v43, %v1837_v57  ;;  %v1982_v45 = vunpack.i.l.bf16 %v1981_v2  ;;  %v899_v21 = vmul.f32 %v1815_v39, %v2554_v0 }
 0x123   : > { %v2669_v28 = vpop.f32.mrf.mxu1  ;;  %v1368_v30 = vadd.f32 %v1367_v46, %v1337_v54  ;;  %v942_v48 = vsel %vm935_vm1, %v2674_v40, -inf  ;;  %v2693_v18 = vadd.f32 %v2592_v7, %v906_v35  ;;  %v1341_v1 = vmul.f32 %v1985_v23, %v1181_v42  ;;  %v1819_v22 = vpop.f32.mrf.mxu0 }
 0x124   : > { %v1986_v54 = vpop.trf.xlu0  ;;  %v1340_v16 = vmul.f32 %v1982_v45, %v1180_v38  ;;  %v1514_v0 = vadd.f32 %v1513_v33, %v1483_v17  ;;  %v1484_v41 = vsel %vm1452_vm7, %v1182_v29, 0.0  ;;  %v1185_v53 = vunpack.c.h.bf16 %v2388_v9  ;;  %v894_v34 = vpop.permute.xlu1 %893 }
 0x125   : > { %v2678_v36 = vpop.f32.mrf.mxu1  ;;  %964 = vmax.xlane.f32.xlu1 %v963_v5  ;;  %v1369_v31 = vadd.f32 %v1368_v30, %v1338_v56  ;;  %v1990_v59 = vunpack.i.h.bf16 %v1986_v54  ;;  %v2707_v42 = vadd.s32 %v2443_v50, %v1406_v10  ;;  %v907_v58 = vmul.f32 %v1839_v8, %v874_v26 }
 0x126   : > { %v1987_v3 = vunpack.i.l.bf16 %v1986_v54  ;;  %v1818_v39 = vadd.f32 %v1817_v6, %v1816_v24  ;;  %v966_v61 = vsel %vm935_vm1, %v2693_v18, -inf  ;;  %v2712_v38 = vadd.f32 %v2592_v7, %v899_v21 }
 0x127   : > { %v2685_v63 = vpop.f32.mrf.mxu1  ;;  %v1370_v43 = vadd.f32 %v1369_v31, %v1339_v32  ;;  %v1485_v17 = vsel %vm1453_vm8, %v1183_v19, 0.0  ;;  %v1820_v32 = vpop.f32.mrf.mxu0  ;;  %v1343_v24 = vmul.f32 %v1990_v59, %v1183_v19  ;;  %v1842_v30 = vadd.f32 %v2655_v25, %v2645_v12  ;;  %v2730_v31 = vld [vmem:[%s2308_s16 + $0x68] sm:$0xff] }
 0x128   : > { %v1991_v5 = vpop.trf.xlu0  ;;  %v1342_v6 = vmul.f32 %v1987_v3, %v1182_v29  ;;  %v1515_v23 = vadd.f32 %v1514_v0, %v1484_v41  ;;  %vm1454_vm9 = vcmp.eq.s32.totalorder %v2707_v42, %v2447_v52  ;;  %v2727_v33 = vadd.f32 %v2592_v7, %v907_v58 }
 0x129   : > { %v2697_v57 = vpop.f32.mrf.mxu1  ;;  %943 = vmax.xlane.f32.xlu1 %v942_v48  ;;  %v1371_v46 = vadd.f32 %v1370_v43, %v1340_v16  ;;  %v1992_v8 = vunpack.i.l.bf16 %v1991_v5  ;;  %v900_v19 = vmul.f32 %v1818_v39, %v2469_v4  ;;  %v945_v29 = vsel %vm935_vm1, %v2712_v38, -inf  ;;  %v1822_v45 = vpop.f32.mrf.mxu0 }
 0x12a   : > { %v1995_v12 = vunpack.i.h.bf16 %v1991_v5  ;;  %v1186_v54 = vunpack.c.l.bf16 %v2730_v31  ;;  %v1407_v43 = vadd.s32 104, %v2445_v51  ;;  %v908_v4 = vmul.f32 %v1842_v30, %v2507_v37 }
 0x12b   : > { %v1849_v35 = vpop.f32.mrf.mxu1  ;;  %v1372_v26 = vadd.f32 %v1371_v46, %v1341_v1  ;;  %v1344_v48 = vmul.f32 %v1992_v8, %v1184_v47  ;;  %v969_v16 = vsel %vm935_vm1, %v2727_v33, -inf  ;;  %v1516_v59 = vadd.f32 %v1515_v23, %v1485_v17  ;;  %v1823_v3 = vpop.f32.mrf.mxu0 }
 0x12c   : > { %v1996_v25 = vpop.trf.xlu0  ;;  %v1486_v0 = vsel %vm1454_vm9, %v1184_v47, 0.0  ;;  %v1821_v41 = vadd.f32 %v1820_v32, %v1819_v22  ;;  %v1345_v37 = vmul.f32 %v1995_v12, %v1185_v53  ;;  %v1187_v17 = vunpack.c.h.bf16 %v2730_v31 }
 0x12d   : > { %v1850_v2 = vpop.f32.mrf.mxu1  ;;  %967 = vmax.xlane.f32.xlu1 %v966_v61  ;;  %v1373_v10 = vadd.f32 %v1372_v26, %v1342_v6  ;;  %v1997_v61 = vunpack.i.l.bf16 %v1996_v25  ;;  %v1845_v47 = vadd.f32 %v2678_v36, %v2669_v28  ;;  %vm1455_vm10 = vcmp.eq.s32.totalorder %v2707_v42, %v2454_v55  ;;  %v1825_v30 = vpop.f32.mrf.mxu0 }
 0x12e   : > { %v1851_v56 = vadd.f32 %v1850_v2, %v1849_v35  ;;  %v2753_v35 = vadd.f32 %v2592_v7, %v900_v19  ;;  %v1517_v22 = vadd.f32 %v1516_v59, %v1486_v0  ;;  %v1424_v5 = vadd.s32 %v2443_v50, %v1407_v43  ;;  %v1159_v59 = vld [vmem:[%s2308_s16 + $0x78] sm:$0xff] }
 0x12f   : > { %v1374_v21 = vadd.f32 %v1373_v10, %v1343_v24  ;;  %v901_v32 = vmul.f32 %v1821_v41, %v2572_v27  ;;  %v2767_v26 = vadd.f32 %v2592_v7, %v908_v4  ;;  %v2000_v24 = vunpack.i.h.bf16 %v1996_v25  ;;  %v1826_v19 = vpop.f32.mrf.mxu0 }
 0x130   : > { %v911_v62 = vmul.f32 %v1851_v56, %v894_v34  ;;  %v2001_v46 = vpop.trf.xlu0  ;;  %v948_v2 = vsel %vm935_vm1, %v2753_v35, -inf  ;;  %v1346_v36 = vmul.f32 %v1997_v61, %v1186_v54  ;;  %v1158_v56 = vld [vmem:[%s2308_s16 + $0x70] sm:$0xff]  ;;  %v1487_v42 = vsel %vm1455_vm10, %v1185_v53, 0.0 }
 0x131   : > { %946 = vmax.xlane.f32.xlu1 %v945_v29  ;;  %v1375_v39 = vadd.f32 %v1374_v21, %v1344_v48  ;;  %v909_v23 = vmul.f32 %v1845_v47, %v2687_v15  ;;  %vm1456_vm11 = vcmp.eq.s32.totalorder %v1424_v5, %v2447_v52  ;;  %v1408_v27 = vadd.s32 112, %v2445_v51 }
 0x132   : > { %v2738_v1 = vadd.f32 %v2592_v7, %v911_v62  ;;  %v1824_v34 = vadd.f32 %v1823_v3, %v1822_v45  ;;  %v972_v10 = vsel %vm935_vm1, %v2767_v26, -inf  ;;  %v2780_v8 = vadd.f32 %v2592_v7, %v901_v32 }
 0x133   : > { %v1376_v28 = vadd.f32 %v1375_v39, %v1345_v37  ;;  %v1188_v31 = vunpack.c.l.bf16 %v1158_v56  ;;  %v1518_v62 = vadd.f32 %v1517_v22, %v1487_v42  ;;  %v1347_v9 = vmul.f32 %v2000_v24, %v1187_v17 }
 0x134   : > { %v981_v58 = vsel %vm935_vm1, %v2738_v1, -inf  ;;  %v2769_v6 = vpop.trf.xlu0  ;;  %v2002_v29 = vunpack.i.l.bf16 %v2001_v46  ;;  %v1488_v15 = vsel %vm1456_vm11, %v1186_v54, 0.0  ;;  %v2783_v12 = vadd.f32 %v2592_v7, %v909_v23 }
 0x135   : > { %970 = vmax.xlane.f32.xlu1 %v969_v16  ;;  %982 = vmax.xlane.f32.xlu0 %v981_v58  ;;  %v1377_v53 = vadd.f32 %v1376_v28, %v1346_v36  ;;  %v1425_v25 = vadd.s32 %v2443_v50, %v1408_v27  ;;  %vm1457_vm12 = vcmp.eq.s32.totalorder %v1424_v5, %v2454_v55  ;;  %v951_v48 = vsel %vm935_vm1, %v2780_v8, -inf }
 0x136   : > { %v902_v45 = vmul.f32 %v1824_v34, %v2478_v14  ;;  %v1827_v21 = vadd.f32 %v1826_v19, %v1825_v30  ;;  %v1189_v43 = vunpack.c.h.bf16 %v1158_v56  ;;  %v2005_v4 = vunpack.i.h.bf16 %v2001_v46 }
 0x137   : > { %v1348_v16 = vmul.f32 %v2002_v29, %v1188_v31  ;;  %v1378_v0 = vadd.f32 %v1377_v53, %v1347_v9  ;;  %v1519_v54 = vadd.f32 %v1518_v62, %v1488_v15  ;;  %v1489_v41 = vsel %vm1457_vm12, %v1187_v17, 0.0 }
 0x138   : > { %v1848_v58 = vadd.f32 %v2697_v57, %v2685_v63  ;;  %v1409_v37 = vadd.s32 120, %v2445_v51  ;;  %vm1458_vm13 = vcmp.eq.s32.totalorder %v1425_v25, %v2447_v52  ;;  %v903_v14 = vmul.f32 %v1827_v21, %v2602_v44 }
 0x139   : > { %949 = vmax.xlane.f32.xlu1 %v948_v2  ;;  %v975_v3 = vsel %vm935_vm1, %v2783_v12, -inf  ;;  %v2799_v39 = vadd.f32 %v2592_v7, %v902_v45  ;;  %v1190_v46 = vunpack.c.l.bf16 %v1159_v59  ;;  %v2007_v61 = vunpack.i.l.bf16 %v2769_v6 }
 0x13a   : > { %v1349_v17 = vmul.f32 %v2005_v4, %v1189_v43  ;;  %v1379_v47 = vadd.f32 %v1378_v0, %v1348_v16  ;;  %v1520_v22 = vadd.f32 %v1519_v54, %v1489_v41  ;;  %v1490_v63 = vsel %vm1458_vm13, %v1188_v31, 0.0 }
 0x13b   : > { %v1426_v51 = vadd.s32 %v2443_v50, %v1409_v37  ;;  %vm1459_vm14 = vcmp.eq.s32.totalorder %v1425_v25, %v2454_v55  ;;  %v910_v44 = vmul.f32 %v1848_v58, %v2516_v49  ;;  %v954_v57 = vsel %vm935_vm1, %v2799_v39, -inf }
 0x13c   : > { %v2808_v5 = vadd.f32 %v2592_v7, %v903_v14  ;;  %v1191_v32 = vunpack.c.h.bf16 %v1159_v59  ;;  %v2010_v2 = vunpack.i.h.bf16 %v2769_v6  ;;  %v1350_v24 = vmul.f32 %v2007_v61, %v1190_v46 }
 0x13d   : > { %973 = vmax.xlane.f32.xlu1 %v972_v10  ;;  %v1380_v30 = vadd.f32 %v1379_v47, %v1349_v17  ;;  %v1521_v28 = vadd.f32 %v1520_v22, %v1490_v63  ;;  %v1491_v36 = vsel %vm1459_vm14, %v1189_v43, 0.0  ;;  %vm1460_vm15 = vcmp.eq.s32.totalorder %v1426_v51, %v2447_v52 }
 0x13e   : > { %v957_v50 = vsel %vm935_vm1, %v2808_v5, -inf  ;;  %v2815_v49 = vadd.f32 %v2592_v7, %v910_v44  ;;  %v1351_v56 = vmul.f32 %v2010_v2, %v1191_v32  ;;  %v1492_v27 = vsel %vm1460_vm15, %v1190_v46, 0.0 }
 0x13f   : > { %v1381_v42 = vadd.f32 %v1380_v30, %v1350_v24  ;;  %v1522_v23 = vadd.f32 %v1521_v28, %v1491_v36  ;;  %vm1461_vm0 = vcmp.eq.s32.totalorder %v1426_v51, %v2454_v55 }
 0x140   : > { %v978_v6 = vsel %vm935_vm1, %v2815_v49, -inf  ;;  %v1493_v52 = vsel %vm1461_vm0, %v1191_v32, 0.0 }
 0x141   : > { %952 = vmax.xlane.f32.xlu1 %v951_v48  ;;  %v1382_v34 = vadd.f32 %v1381_v42, %v1351_v56  ;;  %v1523_v10 = vadd.f32 %v1522_v23, %v1492_v27 }
 0x143   : > { %v1524_v31 = vadd.f32 %v1523_v10, %v1493_v52 }
 0x145   : > { %976 = vmax.xlane.f32.xlu1 %v975_v3 }
 0x149   : > { %955 = vmax.xlane.f32.xlu1 %v954_v57 }
 0x14d   : > { %958 = vmax.xlane.f32.xlu1 %v957_v50 }
 0x151   : > { %979 = vmax.xlane.f32.xlu1 %v978_v6 }
 0x155   : > { %1383 = vadd.xlane.f32.xlu1 %v1382_v34 }
 0x159   : > { %1525 = vadd.xlane.f32.xlu1 %v1524_v31 }
 0x1a2   : > { %v938_v19 = vpop.xlane.xlu1 %937 }
 0x1a3   : > { %v2821_v7 = vsub.f32 %v2609_v11, %v938_v19 }
 0x1a5   : > { %v1000_v62 = vmul.f32 1.442695, %v2821_v7 }
 0x1a6   : > { %v962_v9 = vpop.xlane.xlu1 %961 }
 0x1a7   : > { %2044 = vpow2.f32 %v1000_v62  ;;  %v2825_v55 = vsub.f32 %v2619_v13, %v962_v9 }
 0x1a9   : > { %v1016_v53 = vmul.f32 1.442695, %v2825_v55 }
 0x1aa   : > { %v941_v29 = vpop.xlane.xlu1 %940 }
 0x1ab   : > { %2046 = vpow2.f32 %v1016_v53  ;;  %v2829_v15 = vsub.f32 %v2636_v60, %v941_v29 }
 0x1ad   : > { %v1002_v25 = vmul.f32 1.442695, %v2829_v15 }
 0x1ae   : > { %v965_v45 = vpop.xlane.xlu1 %964 }
 0x1af   : > { %2048 = vpow2.f32 %v1002_v25  ;;  %v2833_v11 = vsub.f32 %v2651_v20, %v965_v45 }
 0x1b1   : > { %v1018_v21 = vmul.f32 1.442695, %v2833_v11 }
 0x1b2   : > { %v944_v48 = vpop.xlane.xlu1 %943 }
 0x1b3   : > { %2050 = vpow2.f32 %v1018_v21  ;;  %v2837_v13 = vsub.f32 %v2674_v40, %v944_v48 }
 0x1b4   : > { %v2045_v43 = vpop.eup %2044 }
 0x1b5   : > { %v1004_v4 = vmul.f32 1.442695, %v2837_v13  ;;  %v1032_v60 = vsel %vm935_vm1, %v2045_v43, 0.0 }
 0x1b6   : > { %v968_v16 = vpop.xlane.xlu1 %967  ;;  %1033 = vadd.xlane.f32.xlu1 %v1032_v60 }
 0x1b7   : > { %2052 = vpow2.f32 %v1004_v4  ;;  %v2842_v59 = vsub.f32 %v2693_v18, %v968_v16 }
 0x1b8   : > { %v2047_v20 = vpop.eup %2046 }
 0x1b9   : > { %v1020_v0 = vmul.f32 1.442695, %v2842_v59  ;;  %v1056_v54 = vsel %vm935_vm1, %v2047_v20, 0.0 }
 0x1ba   : > { %v947_v41 = vpop.xlane.xlu1 %946  ;;  %1057 = vadd.xlane.f32.xlu1 %v1056_v54 }
 0x1bb   : > { %2054 = vpow2.f32 %v1020_v0  ;;  %v2847_v40 = vsub.f32 %v2712_v38, %v947_v41 }
 0x1bc   : > { %v2049_v58 = vpop.eup %2048 }
 0x1bd   : > { %v1006_v37 = vmul.f32 1.442695, %v2847_v40  ;;  %v1035_v14 = vsel %vm935_vm1, %v2049_v58, 0.0 }
 0x1be   : > { %v971_v3 = vpop.xlane.xlu1 %970  ;;  %1036 = vadd.xlane.f32.xlu1 %v1035_v14  ;;  %v983_v24 = vpop.xlane.xlu0 %982 }
 0x1bf   : > { %2056 = vpow2.f32 %v1006_v37  ;;  %v2852_v18 = vsub.f32 %v2727_v33, %v971_v3  ;;  %v2870_v36 = vsub.f32 %v2738_v1, %v983_v24 }
 0x1c0   : > { %v2051_v46 = vpop.eup %2050 }
 0x1c1   : > { %v1022_v61 = vmul.f32 1.442695, %v2852_v18  ;;  %v1059_v17 = vsel %vm935_vm1, %v2051_v46, 0.0  ;;  %v1030_v27 = vmul.f32 1.442695, %v2870_v36 }
 0x1c2   : > { %v950_v47 = vpop.xlane.xlu1 %949  ;;  %1060 = vadd.xlane.f32.xlu0 %v1059_v17 }
 0x1c3   : > { %2058 = vpow2.f32 %v1022_v61  ;;  %v2857_v38 = vsub.f32 %v2753_v35, %v950_v47 }
 0x1c4   : > { %v2053_v22 = vpop.eup %2052 }
 0x1c5   : > { %v1008_v63 = vmul.f32 1.442695, %v2857_v38  ;;  %v1038_v51 = vsel %vm935_vm1, %v2053_v22, 0.0 }
 0x1c6   : > { %v974_v44 = vpop.xlane.xlu1 %973  ;;  %1039 = vadd.xlane.f32.xlu1 %v1038_v51 }
 0x1c7   : > { %2060 = vpow2.f32 %v1008_v63  ;;  %v2862_v33 = vsub.f32 %v2767_v26, %v974_v44 }
 0x1c8   : > { %v2055_v57 = vpop.eup %2054 }
 0x1c9   : > { %v1024_v32 = vmul.f32 1.442695, %v2862_v33  ;;  %v1062_v2 = vsel %vm935_vm1, %v2055_v57, 0.0 }
 0x1ca   : > { %v953_v30 = vpop.xlane.xlu1 %952  ;;  %1063 = vadd.xlane.f32.xlu1 %v1062_v2 }
 0x1cb   : > { %2062 = vpow2.f32 %v1024_v32  ;;  %v2867_v35 = vsub.f32 %v2780_v8, %v953_v30 }
 0x1cc   : > { %v2057_v28 = vpop.eup %2056 }
 0x1cd   : > { %v1010_v50 = vmul.f32 1.442695, %v2867_v35  ;;  %v1041_v26 = vsel %vm935_vm1, %v2057_v28, 0.0 }
 0x1ce   : > { %v977_v56 = vpop.xlane.xlu1 %976  ;;  %1042 = vadd.xlane.f32.xlu1 %v1041_v26 }
 0x1cf   : > { %2064 = vpow2.f32 %v1010_v50  ;;  %v2875_v42 = vsub.f32 %v2783_v12, %v977_v56 }
 0x1d0   : > { %v2059_v23 = vpop.eup %2058 }
 0x1d1   : > { %v1026_v8 = vmul.f32 1.442695, %v2875_v42  ;;  %v1065_v6 = vsel %vm935_vm1, %v2059_v23, 0.0 }
 0x1d2   : > { %v956_v34 = vpop.xlane.xlu1 %955  ;;  %1066 = vadd.xlane.f32.xlu0 %v1065_v6 }
 0x1d3   : > { %2066 = vpow2.f32 %v1026_v8  ;;  %v2881_v1 = vsub.f32 %v2799_v39, %v956_v34 }
 0x1d4   : > { %v2061_v10 = vpop.eup %2060  ;;  %2068 = vpow2.f32 %v1030_v27 }
 0x1d5   : > { %v1012_v52 = vmul.f32 1.442695, %v2881_v1  ;;  %v1044_v12 = vsel %vm935_vm1, %v2061_v10, 0.0 }
 0x1d6   : > { %v959_v31 = vpop.xlane.xlu1 %958  ;;  %1045 = vadd.xlane.f32.xlu1 %v1044_v12 }
 0x1d7   : > { %2070 = vpow2.f32 %v1012_v52  ;;  %v2886_v19 = vsub.f32 %v2808_v5, %v959_v31 }
 0x1d8   : > { %v2063_v62 = vpop.eup %2062 }
 0x1d9   : > { %v1014_v9 = vmul.f32 1.442695, %v2886_v19  ;;  %v1068_v53 = vsel %vm935_vm1, %v2063_v62, 0.0 }
 0x1da   : > { %v980_v29 = vpop.xlane.xlu1 %979  ;;  %1069 = vadd.xlane.f32.xlu1 %v1068_v53 }
 0x1db   : > { %2072 = vpow2.f32 %v1014_v9  ;;  %v2891_v39 = vsub.f32 %v2815_v49, %v980_v29 }
 0x1dc   : > { %v2065_v25 = vpop.eup %2064 }
 0x1dd   : > { %v1028_v45 = vmul.f32 1.442695, %v2891_v39  ;;  %v1047_v21 = vsel %vm935_vm1, %v2065_v25, 0.0 }
 0x1de   : > { %1048 = vadd.xlane.f32.xlu1 %v1047_v21  ;;  %v1384_v48 = vpop.xlane.xlu1 %1383 }
 0x1df   : > { %2074 = vpow2.f32 %v1028_v45  ;;  %v1385_v5 = vrot.slane %v1384_v48, 4 }
 0x1e0   : > { %v2067_v43 = vpop.eup %2066 }
 0x1e1   : > { %v1071_v4 = vsel %vm935_vm1, %v2067_v43, 0.0  ;;  %v1386_v60 = vadd.f32 %v1385_v5, %v1384_v48  ;;  %v2069_v16 = vpop.eup %2068 }
 0x1e2   : > { %1072 = vadd.xlane.f32.xlu0 %v1071_v4  ;;  %v1526_v20 = vpop.xlane.xlu1 %1525  ;;  %v1077_v41 = vsel %vm935_vm1, %v2069_v16, 0.0 }
 0x1e3   : > { %v1387_v0 = vrot.slane %v1386_v60, 2  ;;  %v1527_v54 = vrot.slane %v1526_v20, 4 }
 0x1e4   : > { %v2071_v49 = vpop.eup %2070 }
 0x1e5   : > { %v1050_v58 = vsel %vm935_vm1, %v2071_v49, 0.0  ;;  %v1528_v37 = vadd.f32 %v1527_v54, %v1526_v20  ;;  %v1388_v14 = vadd.f32 %v1387_v0, %v1386_v60 }
 0x1e6   : > { %1078 = vadd.xlane.f32.xlu0 %v1077_v41  ;;  %1051 = vadd.xlane.f32.xlu1 %v1050_v58 }
 0x1e7   : > { %v1529_v3 = vrot.slane %v1528_v37, 2  ;;  %v1389_v46 = vrot.slane %v1388_v14, 1 }
 0x1e8   : > { %v2073_v61 = vpop.eup %2072 }
 0x1e9   : > { %v1053_v17 = vsel %vm935_vm1, %v2073_v61, 0.0  ;;  %v1390_v47 = vadd.f32 %v1389_v46, %v1388_v14  ;;  %v1530_v22 = vadd.f32 %v1529_v3, %v1528_v37 }
 0x1ea   : > { %1054 = vadd.xlane.f32.xlu1 %v1053_v17 }
 0x1eb   : > { %1868 = vpush %v1390_v47  ;;  %v1531_v63 = vrot.slane %v1530_v22, 1 }
 0x1ec   : > { %v2075_v51 = vpop.eup %2074 }
 0x1ed   : > { %v1074_v44 = vsel %vm935_vm1, %v2075_v51, 0.0  ;;  %v1532_v57 = vadd.f32 %v1531_v63, %v1530_v22 }
 0x1ee   : > { %1075 = vadd.xlane.f32.xlu1 %v1074_v44 }
 0x1ef   : > { %1870 = vpush %v1532_v57 }
 0x21c   : > { %s1869_s16 = spop %1868 }
 0x220   : > { %s1871_s23 = spop %1870 }
 0x221   : > { %s1534_s26 = smul.f32 2.0, %s1871_s23 }
 0x223   : > { %s1535_s29 = ssub.f32 %s1869_s16, %s1534_s26 }
 0x225   : > { %s1536_s10 = sadd.f32 128.0, %s1535_s29 }
 0x227   : > { %v1537_v32 = vstv %s1536_s10 }
 0x228   : > { %1538 = vst [vmem:[%s477_s9] sm:$0xff] %v1537_v32 }
 0x23f   : > { %v1034_v2 = vpop.xlane.xlu1 %1033 }
 0x240   : > { %2076 = vlog2.f32 %v1034_v2 }
 0x243   : > { %v1058_v24 = vpop.xlane.xlu1 %1057 }
 0x244   : > { %2078 = vlog2.f32 %v1058_v24 }
 0x247   : > { %v1037_v30 = vpop.xlane.xlu1 %1036 }
 0x248   : > { %2080 = vlog2.f32 %v1037_v30 }
 0x24b   : > { %v1061_v28 = vpop.xlane.xlu0 %1060 }
 0x24c   : > { %2082 = vlog2.f32 %v1061_v28 }
 0x24d   : > { %v2077_v50 = vpop.eup %2076 }
 0x24e   : > { %v1081_v26 = vmul.f32 0.6931472, %v2077_v50 }
 0x24f   : > { %v1040_v56 = vpop.xlane.xlu1 %1039 }
 0x250   : > { %v1112_v23 = vsub.f32 %v2821_v7, %v1081_v26  ;;  %2084 = vlog2.f32 %v1040_v56 }
 0x251   : > { %v2079_v27 = vpop.eup %2078 }
 0x252   : > { %1128 = vst.msk [vmem:[%s2909_s12] sm:$0xff] %vm935_vm1, %v1112_v23  ;;  %v1097_v8 = vmul.f32 0.6931472, %v2079_v27 }
 0x253   : > { %v1064_v6 = vpop.xlane.xlu1 %1063 }
 0x254   : > { %v1120_v34 = vsub.f32 %v2825_v55, %v1097_v8  ;;  %2086 = vlog2.f32 %v1064_v6 }
 0x255   : > { %v2081_v10 = vpop.eup %2080 }
 0x256   : > { %1136 = vst.msk [vmem:[%s2909_s12 + $0x40] sm:$0xff] %vm935_vm1, %v1120_v34  ;;  %v1083_v52 = vmul.f32 0.6931472, %v2081_v10 }
 0x257   : > { %v1043_v12 = vpop.xlane.xlu1 %1042 }
 0x258   : > { %v1113_v31 = vsub.f32 %v2829_v15, %v1083_v52  ;;  %2088 = vlog2.f32 %v1043_v12 }
 0x259   : > { %v2083_v7 = vpop.eup %2082 }
 0x25a   : > { %1129 = vst.msk [vmem:[%s2909_s12 + $0x8] sm:$0xff] %vm935_vm1, %v1113_v31  ;;  %v1099_v62 = vmul.f32 0.6931472, %v2083_v7 }
 0x25b   : > { %v1067_v9 = vpop.xlane.xlu0 %1066 }
 0x25c   : > { %v1121_v53 = vsub.f32 %v2833_v11, %v1099_v62  ;;  %2090 = vlog2.f32 %v1067_v9 }
 0x25d   : > { %v2085_v55 = vpop.eup %2084 }
 0x25e   : > { %1137 = vst.msk [vmem:[%s2909_s12 + $0x48] sm:$0xff] %vm935_vm1, %v1121_v53  ;;  %v1085_v29 = vmul.f32 0.6931472, %v2085_v55 }
 0x25f   : > { %v1046_v25 = vpop.xlane.xlu1 %1045 }
 0x260   : > { %v1114_v45 = vsub.f32 %v2837_v13, %v1085_v29  ;;  %2092 = vlog2.f32 %v1046_v25 }
 0x261   : > { %v2087_v15 = vpop.eup %2086 }
 0x262   : > { %1130 = vst.msk [vmem:[%s2909_s12 + $0x10] sm:$0xff] %vm935_vm1, %v1114_v45  ;;  %v1101_v21 = vmul.f32 0.6931472, %v2087_v15 }
 0x263   : > { %v1070_v48 = vpop.xlane.xlu1 %1069 }
 0x264   : > { %v1122_v5 = vsub.f32 %v2842_v59, %v1101_v21  ;;  %2094 = vlog2.f32 %v1070_v48 }
 0x265   : > { %v2089_v11 = vpop.eup %2088 }
 0x266   : > { %1138 = vst.msk [vmem:[%s2909_s12 + $0x50] sm:$0xff] %vm935_vm1, %v1122_v5  ;;  %v1087_v43 = vmul.f32 0.6931472, %v2089_v11 }
 0x267   : > { %v1049_v4 = vpop.xlane.xlu1 %1048 }
 0x268   : > { %v1115_v60 = vsub.f32 %v2847_v40, %v1087_v43  ;;  %2096 = vlog2.f32 %v1049_v4 }
 0x269   : > { %v2091_v13 = vpop.eup %2090 }
 0x26a   : > { %1131 = vst.msk [vmem:[%s2909_s12 + $0x18] sm:$0xff] %vm935_vm1, %v1115_v60  ;;  %v1103_v16 = vmul.f32 0.6931472, %v2091_v13 }
 0x26b   : > { %v1073_v20 = vpop.xlane.xlu0 %1072 }
 0x26c   : > { %v1123_v0 = vsub.f32 %v2852_v18, %v1103_v16  ;;  %2098 = vlog2.f32 %v1073_v20 }
 0x26d   : > { %v2093_v59 = vpop.eup %2092 }
 0x26e   : > { %1139 = vst.msk [vmem:[%s2909_s12 + $0x58] sm:$0xff] %vm935_vm1, %v1123_v0  ;;  %v1089_v54 = vmul.f32 0.6931472, %v2093_v59 }
 0x26f   : > { %v1079_v49 = vpop.xlane.xlu0 %1078  ;;  %v1052_v41 = vpop.xlane.xlu1 %1051 }
 0x270   : > { %v1116_v58 = vsub.f32 %v2857_v38, %v1089_v54  ;;  %2100 = vlog2.f32 %v1079_v49 }
 0x271   : > { %v2095_v40 = vpop.eup %2094  ;;  %2102 = vlog2.f32 %v1052_v41 }
 0x272   : > { %1132 = vst.msk [vmem:[%s2909_s12 + $0x20] sm:$0xff] %vm935_vm1, %v1116_v58  ;;  %v1105_v37 = vmul.f32 0.6931472, %v2095_v40 }
 0x273   : > { %v1055_v14 = vpop.xlane.xlu1 %1054 }
 0x274   : > { %v1124_v18 = vsub.f32 %v2862_v33, %v1105_v37  ;;  %2104 = vlog2.f32 %v1055_v14 }
 0x275   : > { %v2097_v3 = vpop.eup %2096 }
 0x276   : > { %1140 = vst.msk [vmem:[%s2909_s12 + $0x60] sm:$0xff] %vm935_vm1, %v1124_v18  ;;  %v1091_v46 = vmul.f32 0.6931472, %v2097_v3 }
 0x277   : > { %v1076_v61 = vpop.xlane.xlu1 %1075 }
 0x278   : > { %v1117_v38 = vsub.f32 %v2867_v35, %v1091_v46  ;;  %2106 = vlog2.f32 %v1076_v61 }
 0x279   : > { %v2099_v17 = vpop.eup %2098 }
 0x27a   : > { %1133 = vst.msk [vmem:[%s2909_s12 + $0x28] sm:$0xff] %vm935_vm1, %v1117_v38  ;;  %v1107_v47 = vmul.f32 0.6931472, %v2099_v17 }
 0x27c   : > { %v1125_v22 = vsub.f32 %v2875_v42, %v1107_v47 }
 0x27d   : > { %v2101_v63 = vpop.eup %2100 }
 0x27e   : > { %v2103_v33 = vpop.eup %2102  ;;  %1141 = vst.msk [vmem:[%s2909_s12 + $0x68] sm:$0xff] %vm935_vm1, %v1125_v22  ;;  %v1111_v51 = vmul.f32 0.6931472, %v2101_v63 }
 0x27f   : > { %v1093_v44 = vmul.f32 0.6931472, %v2103_v33 }
 0x280   : > { %v1127_v57 = vsub.f32 %v2870_v36, %v1111_v51 }
 0x281   : > { %v2105_v32 = vpop.eup %2104  ;;  %v1118_v35 = vsub.f32 %v2881_v1, %v1093_v44 }
 0x282   : > { %1143 = vst.msk [vmem:[%s2909_s12 + $0x78] sm:$0xff] %vm935_vm1, %v1127_v57  ;;  %v1095_v2 = vmul.f32 0.6931472, %v2105_v32 }
 0x283   : > { %1134 = vst.msk [vmem:[%s2909_s12 + $0x30] sm:$0xff] %vm935_vm1, %v1118_v35 }
 0x284   : > { %v1119_v24 = vsub.f32 %v2886_v19, %v1095_v2 }
 0x285   : > { %v2107_v42 = vpop.eup %2106 }
 0x286   : > { %1135 = vst.msk [vmem:[%s2909_s12 + $0x38] sm:$0xff] %vm935_vm1, %v1119_v24  ;;  %v1109_v30 = vmul.f32 0.6931472, %v2107_v42 }
 0x288   : > { %v1126_v28 = vsub.f32 %v2891_v39, %v1109_v30 }
 0x28a   : > { %1142 = vst.msk [vmem:[%s2909_s12 + $0x70] sm:$0xff] %vm935_vm1, %v1126_v28 }
 0x28b PF: > { %p14_p10 = scmp.ge.s32.totalorder %s2187_s25, 4   ;;  %s2976_s21 = smov %s2126_s22 }
 0x28c   : > { %s2977_s22 = smov %s2196_s28  ;;  %s2978_s23 = smov %s2187_s25 }
 0x28d   :  { %16 = sbr.rel (!%p14_p10) target bundleno = 2 (0x2), region = 134 }

</bundles_post_ra>
